<compile_context>
chip_gen: v6e
topology: v6e:2x2x1
jax: 0.10.0
libtpu: 0.0.40
codegen_flags: <defaults>
</compile_context>

<pallas_src>
import math

import jax
import jax.numpy as jnp
from jax import lax
from jax.experimental import pallas as pl
from jax.experimental.pallas import tpu as pltpu

# Small config consistent with the module's forward
B = 2        # batch
T = 8        # sequence length
C = 32       # n_embd
N_HEAD = 4   # n_head
HEAD_DIM = C // N_HEAD
BT = B * T

_NEG = -1e30                    # finite mask value (NaN-safe)
_PREC = lax.Precision.HIGHEST   # full-f32 MXU passes so kernel == reference


def _attn_kernel(x_ref, wqkv_ref, bqkv_ref, wproj_ref, bproj_ref, bias_ref, o_ref):
    # x_ref: (B*T, C) — whole batch flattened; projections are single matmuls.
    x = x_ref[...]

    # QKV projection: one (BT, C) @ (C, 3C) MXU matmul.  The 1/sqrt(hd) scale
    # is already folded into the Q columns of wqkv/bqkv by the wrapper.
    qkv = jnp.dot(x, wqkv_ref[...], preferred_element_type=jnp.float32,
                  precision=_PREC)
    qkv = qkv + bqkv_ref[...]                       # (1, 3C) broadcasts over rows

    # Precomputed additive bias: 0 where (same batch AND causal), -1e30 elsewhere.
    bias = bias_ref[...]                            # (BT, BT)

    heads = []
    for h in range(N_HEAD):                         # static unroll, H = 4
        lo = h * HEAD_DIM
        qh = qkv[:, 0 * C + lo:0 * C + lo + HEAD_DIM]
        kh = qkv[:, 1 * C + lo:1 * C + lo + HEAD_DIM]
        vh = qkv[:, 2 * C + lo:2 * C + lo + HEAD_DIM]

        # q @ k^T without materializing a transpose: contract last dims.
        s = lax.dot_general(qh, kh, (((1,), (1,)), ((), ())),
                            preferred_element_type=jnp.float32,
                            precision=_PREC)        # (BT, BT)
        s = s + bias
        s = s - jnp.max(s, axis=-1, keepdims=True)
        p = jnp.exp(s)
        l = jnp.sum(p, axis=-1, keepdims=True)      # (BT, 1)

        # Unnormalized PV, then exact normalization on the small (BT, hd) tile
        # (cheaper than dividing the (BT, BT) probability matrix; exact, so no
        # approx-reciprocal numeric drift).
        yh = jnp.dot(p, vh, preferred_element_type=jnp.float32,
                     precision=_PREC)               # (BT, hd)
        heads.append(yh / l)

    # Head concat -> one lane-dense (BT, C) slab -> ONE projection matmul.
    y = jnp.concatenate(heads, axis=-1)             # (BT, C)
    out = jnp.dot(y, wproj_ref[...], preferred_element_type=jnp.float32,
                  precision=_PREC)
    out = out + bproj_ref[...]
    o_ref[...] = out.astype(o_ref.dtype)


def causal_self_attention(x, w_qkv, b_qkv, w_proj, b_proj):
    """x: (B, T, C); w_qkv: (C, 3C); b_qkv: (1, 3C); w_proj: (C, C); b_proj: (1, C)."""
    Bx, Tx, Cx = x.shape
    assert (Bx, Tx, Cx) == (B, T, C)
    x2d = x.reshape(BT, C)                          # free in XLA; 16-row matmuls inside

    # Parameter prep (would be done once at load time in a real model):
    # fold 1/sqrt(head_dim) into the Q columns of the QKV weight and bias.
    scale = 1.0 / math.sqrt(HEAD_DIM)
    w_qkv_s = w_qkv.at[:, :C].multiply(scale)
    b_qkv_s = b_qkv.at[:, :C].multiply(scale)

    # Combined same-batch + causal additive bias, computed once outside the
    # kernel (loop-invariant, 1 KiB).
    row = lax.broadcasted_iota(jnp.int32, (BT, BT), 0)
    col = lax.broadcasted_iota(jnp.int32, (BT, BT), 1)
    mask = (row // T == col // T) & (col <= row)
    bias = jnp.where(mask, 0.0, _NEG).astype(jnp.float32)

    out2d = pl.pallas_call(
        _attn_kernel,
        out_shape=jax.ShapeDtypeStruct((BT, C), x.dtype),
        grid_spec=pltpu.PrefetchScalarGridSpec(
            num_scalar_prefetch=0,
            grid=(1,),                              # single step: whole working set ~20 KiB
            in_specs=[
                pl.BlockSpec((BT, C), lambda i: (0, 0)),
                pl.BlockSpec((C, 3 * C), lambda i: (0, 0)),
                pl.BlockSpec((1, 3 * C), lambda i: (0, 0)),
                pl.BlockSpec((C, C), lambda i: (0, 0)),
                pl.BlockSpec((1, C), lambda i: (0, 0)),
                pl.BlockSpec((BT, BT), lambda i: (0, 0)),
            ],
            out_specs=pl.BlockSpec((BT, C), lambda i: (0, 0)),
        ),
        compiler_params=pltpu.CompilerParams(
            dimension_semantics=("arbitrary",)),    # no megacore split of trivial work
    )(x2d, w_qkv_s, b_qkv_s, w_proj, b_proj, bias)

    return out2d.reshape(Bx, Tx, Cx)


def _reference(x, w_qkv, b_qkv, w_proj, b_proj):
    """Pure-JAX reference matching PyTorch semantics."""
    Bx, Tx, Cx = x.shape
    qkv = jnp.einsum("btc,cd->btd", x, w_qkv, precision=_PREC) + b_qkv[0]
    q, k, v = jnp.split(qkv, 3, axis=-1)

    def heads(t):  # (B,T,C) -> (B,H,T,hd)
        return t.reshape(Bx, Tx, N_HEAD, HEAD_DIM).transpose(0, 2, 1, 3)

    q, k, v = heads(q), heads(k), heads(v)
    s = jnp.einsum("bhqd,bhkd->bhqk", q, k, precision=_PREC) / math.sqrt(HEAD_DIM)
    mask = jnp.tril(jnp.ones((Tx, Tx), dtype=bool))
    s = jnp.where(mask, s, -jnp.inf)
    p = jax.nn.softmax(s, axis=-1)
    y = jnp.einsum("bhqk,bhkd->bhqd", p, v, precision=_PREC)
    y = y.transpose(0, 2, 1, 3).reshape(Bx, Tx, Cx)
    return jnp.einsum("btc,cd->btd", y, w_proj, precision=_PREC) + b_proj[0]


if __name__ == "__main__":
    key = jax.random.PRNGKey(0)
    kx, k1, k2, k3, k4 = jax.random.split(key, 5)

    x = jax.random.normal(kx, (B, T, C), dtype=jnp.float32)

    # Deterministic synthetic parameters (stored as (in, out), i.e. W.T of nn.Linear)
    w_qkv = jax.random.normal(k1, (C, 3 * C), dtype=jnp.float32) * (1.0 / math.sqrt(C))
    b_qkv = jax.random.normal(k2, (1, 3 * C), dtype=jnp.float32) * 0.02
    w_proj = jax.random.normal(k3, (C, C), dtype=jnp.float32) * (1.0 / math.sqrt(C))
    b_proj = jax.random.normal(k4, (1, C), dtype=jnp.float32) * 0.02

    out = causal_self_attention(x, w_qkv, b_qkv, w_proj, b_proj)
    out = jax.block_until_ready(out)

    ref = _reference(x, w_qkv, b_qkv, w_proj, b_proj)
    assert out.shape == (B, T, C)
    # Exact softmax normalization + HIGHEST-precision matmuls on both sides:
    # agreement is at f32 rounding level.
    assert jnp.allclose(out, ref, atol=5e-4, rtol=5e-4), "mismatch vs reference"

    print("KERNEL_OK")
</pallas_src>

<mosaic_0001>
module attributes {stable_mosaic.version = 11 : i64} {
  func.func @_attn_kernel(%arg0: i32, %arg1: memref<16x32xf32, #tpu.memory_space<vmem>>, %arg2: memref<32x96xf32, #tpu.memory_space<vmem>>, %arg3: memref<1x96xf32, #tpu.memory_space<vmem>>, %arg4: memref<32x32xf32, #tpu.memory_space<vmem>>, %arg5: memref<1x32xf32, #tpu.memory_space<vmem>>, %arg6: memref<16x16xf32, #tpu.memory_space<vmem>>, %arg7: memref<16x32xf32, #tpu.memory_space<vmem>>) attributes {dimension_semantics = [#tpu.dimension_semantics<arbitrary>], iteration_bounds = array<i64: 1>, scalar_prefetch = 0 : i64, scratch_operands = 0 : i64, tpu.core_type = #tpu.core_type<tc>, window_params = [{pipeline_mode = #tpu.pipeline_mode<synchronous>, transform_indices = @transform_0, window_bounds = array<i64: 16, 32>}, {pipeline_mode = #tpu.pipeline_mode<synchronous>, transform_indices = @transform_1, window_bounds = array<i64: 32, 96>}, {pipeline_mode = #tpu.pipeline_mode<synchronous>, transform_indices = @transform_2, window_bounds = array<i64: 1, 96>}, {pipeline_mode = #tpu.pipeline_mode<synchronous>, transform_indices = @transform_3, window_bounds = array<i64: 32, 32>}, {pipeline_mode = #tpu.pipeline_mode<synchronous>, transform_indices = @transform_4, window_bounds = array<i64: 1, 32>}, {pipeline_mode = #tpu.pipeline_mode<synchronous>, transform_indices = @transform_5, window_bounds = array<i64: 16, 16>}, {pipeline_mode = #tpu.pipeline_mode<synchronous>, transform_indices = @transform_6, window_bounds = array<i64: 16, 32>}]} {
    %c0 = arith.constant 0 : index
    %c0_0 = arith.constant 0 : index
    %0 = vector.load %arg1[%c0, %c0_0] : memref<16x32xf32, #tpu.memory_space<vmem>>, vector<16x32xf32>
    %c0_1 = arith.constant 0 : index
    %c0_2 = arith.constant 0 : index
    %1 = vector.load %arg2[%c0_1, %c0_2] : memref<32x96xf32, #tpu.memory_space<vmem>>, vector<32x96xf32>
    %cst = arith.constant dense<0.000000e+00> : vector<16x96xf32>
    %2 = tpu.matmul %0, %1, %cst {dimension_numbers = #tpu.dot_dimension_numbers<[1], [0], [0], [1], [0, 0, 1, 1], [], []>, precision = #tpu.contract_precision<fp32>} : vector<16x32xf32>, vector<32x96xf32>, vector<16x96xf32> -> vector<16x96xf32>
    %c0_3 = arith.constant 0 : index
    %c0_4 = arith.constant 0 : index
    %3 = vector.load %arg3[%c0_3, %c0_4] : memref<1x96xf32, #tpu.memory_space<vmem>>, vector<1x96xf32>
    %4 = vector.broadcast %3 : vector<1x96xf32> to vector<16x96xf32>
    %5 = arith.addf %2, %4 : vector<16x96xf32>
    %c0_5 = arith.constant 0 : index
    %c0_6 = arith.constant 0 : index
    %6 = vector.load %arg6[%c0_5, %c0_6] : memref<16x16xf32, #tpu.memory_space<vmem>>, vector<16x16xf32>
    %7 = vector.extract_strided_slice %5 {offsets = [0, 0], sizes = [16, 8], strides = [1, 1]} : vector<16x96xf32> to vector<16x8xf32>
    %8 = vector.extract_strided_slice %5 {offsets = [0, 32], sizes = [16, 8], strides = [1, 1]} : vector<16x96xf32> to vector<16x8xf32>
    %9 = vector.extract_strided_slice %5 {offsets = [0, 64], sizes = [16, 8], strides = [1, 1]} : vector<16x96xf32> to vector<16x8xf32>
    %cst_7 = arith.constant dense<0.000000e+00> : vector<16x16xf32>
    %10 = tpu.matmul %7, %8, %cst_7 {dimension_numbers = #tpu.dot_dimension_numbers<[1], [1], [0], [0], [0, 0, 1, 0], [], []>, precision = #tpu.contract_precision<fp32>} : vector<16x8xf32>, vector<16x8xf32>, vector<16x16xf32> -> vector<16x16xf32>
    %11 = arith.addf %10, %6 : vector<16x16xf32>
    %cst_8 = arith.constant dense<0xFF800000> : vector<16xf32>
    %12 = vector.multi_reduction <maximumf>, %11, %cst_8 [1] : vector<16x16xf32> to vector<16xf32>
    %13 = vector.shape_cast %12 : vector<16xf32> to vector<16x1xf32>
    %14 = vector.broadcast %13 : vector<16x1xf32> to vector<16x16xf32>
    %15 = arith.subf %11, %14 : vector<16x16xf32>
    %16 = math.exp %15 : vector<16x16xf32>
    %cst_9 = arith.constant dense<0.000000e+00> : vector<16xf32>
    %17 = vector.multi_reduction <add>, %16, %cst_9 [1] : vector<16x16xf32> to vector<16xf32>
    %18 = vector.shape_cast %17 : vector<16xf32> to vector<16x1xf32>
    %cst_10 = arith.constant dense<0.000000e+00> : vector<16x8xf32>
    %19 = tpu.matmul %16, %9, %cst_10 {dimension_numbers = #tpu.dot_dimension_numbers<[1], [0], [0], [1], [0, 0, 1, 1], [], []>, precision = #tpu.contract_precision<fp32>} : vector<16x16xf32>, vector<16x8xf32>, vector<16x8xf32> -> vector<16x8xf32>
    %20 = vector.broadcast %18 : vector<16x1xf32> to vector<16x8xf32>
    %21 = arith.divf %19, %20 : vector<16x8xf32>
    %22 = vector.extract_strided_slice %5 {offsets = [0, 8], sizes = [16, 8], strides = [1, 1]} : vector<16x96xf32> to vector<16x8xf32>
    %23 = vector.extract_strided_slice %5 {offsets = [0, 40], sizes = [16, 8], strides = [1, 1]} : vector<16x96xf32> to vector<16x8xf32>
    %24 = vector.extract_strided_slice %5 {offsets = [0, 72], sizes = [16, 8], strides = [1, 1]} : vector<16x96xf32> to vector<16x8xf32>
    %cst_11 = arith.constant dense<0.000000e+00> : vector<16x16xf32>
    %25 = tpu.matmul %22, %23, %cst_11 {dimension_numbers = #tpu.dot_dimension_numbers<[1], [1], [0], [0], [0, 0, 1, 0], [], []>, precision = #tpu.contract_precision<fp32>} : vector<16x8xf32>, vector<16x8xf32>, vector<16x16xf32> -> vector<16x16xf32>
    %26 = arith.addf %25, %6 : vector<16x16xf32>
    %cst_12 = arith.constant dense<0xFF800000> : vector<16xf32>
    %27 = vector.multi_reduction <maximumf>, %26, %cst_12 [1] : vector<16x16xf32> to vector<16xf32>
    %28 = vector.shape_cast %27 : vector<16xf32> to vector<16x1xf32>
    %29 = vector.broadcast %28 : vector<16x1xf32> to vector<16x16xf32>
    %30 = arith.subf %26, %29 : vector<16x16xf32>
    %31 = math.exp %30 : vector<16x16xf32>
    %cst_13 = arith.constant dense<0.000000e+00> : vector<16xf32>
    %32 = vector.multi_reduction <add>, %31, %cst_13 [1] : vector<16x16xf32> to vector<16xf32>
    %33 = vector.shape_cast %32 : vector<16xf32> to vector<16x1xf32>
    %cst_14 = arith.constant dense<0.000000e+00> : vector<16x8xf32>
    %34 = tpu.matmul %31, %24, %cst_14 {dimension_numbers = #tpu.dot_dimension_numbers<[1], [0], [0], [1], [0, 0, 1, 1], [], []>, precision = #tpu.contract_precision<fp32>} : vector<16x16xf32>, vector<16x8xf32>, vector<16x8xf32> -> vector<16x8xf32>
    %35 = vector.broadcast %33 : vector<16x1xf32> to vector<16x8xf32>
    %36 = arith.divf %34, %35 : vector<16x8xf32>
    %37 = vector.extract_strided_slice %5 {offsets = [0, 16], sizes = [16, 8], strides = [1, 1]} : vector<16x96xf32> to vector<16x8xf32>
    %38 = vector.extract_strided_slice %5 {offsets = [0, 48], sizes = [16, 8], strides = [1, 1]} : vector<16x96xf32> to vector<16x8xf32>
    %39 = vector.extract_strided_slice %5 {offsets = [0, 80], sizes = [16, 8], strides = [1, 1]} : vector<16x96xf32> to vector<16x8xf32>
    %cst_15 = arith.constant dense<0.000000e+00> : vector<16x16xf32>
    %40 = tpu.matmul %37, %38, %cst_15 {dimension_numbers = #tpu.dot_dimension_numbers<[1], [1], [0], [0], [0, 0, 1, 0], [], []>, precision = #tpu.contract_precision<fp32>} : vector<16x8xf32>, vector<16x8xf32>, vector<16x16xf32> -> vector<16x16xf32>
    %41 = arith.addf %40, %6 : vector<16x16xf32>
    %cst_16 = arith.constant dense<0xFF800000> : vector<16xf32>
    %42 = vector.multi_reduction <maximumf>, %41, %cst_16 [1] : vector<16x16xf32> to vector<16xf32>
    %43 = vector.shape_cast %42 : vector<16xf32> to vector<16x1xf32>
    %44 = vector.broadcast %43 : vector<16x1xf32> to vector<16x16xf32>
    %45 = arith.subf %41, %44 : vector<16x16xf32>
    %46 = math.exp %45 : vector<16x16xf32>
    %cst_17 = arith.constant dense<0.000000e+00> : vector<16xf32>
    %47 = vector.multi_reduction <add>, %46, %cst_17 [1] : vector<16x16xf32> to vector<16xf32>
    %48 = vector.shape_cast %47 : vector<16xf32> to vector<16x1xf32>
    %cst_18 = arith.constant dense<0.000000e+00> : vector<16x8xf32>
    %49 = tpu.matmul %46, %39, %cst_18 {dimension_numbers = #tpu.dot_dimension_numbers<[1], [0], [0], [1], [0, 0, 1, 1], [], []>, precision = #tpu.contract_precision<fp32>} : vector<16x16xf32>, vector<16x8xf32>, vector<16x8xf32> -> vector<16x8xf32>
    %50 = vector.broadcast %48 : vector<16x1xf32> to vector<16x8xf32>
    %51 = arith.divf %49, %50 : vector<16x8xf32>
    %52 = vector.extract_strided_slice %5 {offsets = [0, 24], sizes = [16, 8], strides = [1, 1]} : vector<16x96xf32> to vector<16x8xf32>
    %53 = vector.extract_strided_slice %5 {offsets = [0, 56], sizes = [16, 8], strides = [1, 1]} : vector<16x96xf32> to vector<16x8xf32>
    %54 = vector.extract_strided_slice %5 {offsets = [0, 88], sizes = [16, 8], strides = [1, 1]} : vector<16x96xf32> to vector<16x8xf32>
    %cst_19 = arith.constant dense<0.000000e+00> : vector<16x16xf32>
    %55 = tpu.matmul %52, %53, %cst_19 {dimension_numbers = #tpu.dot_dimension_numbers<[1], [1], [0], [0], [0, 0, 1, 0], [], []>, precision = #tpu.contract_precision<fp32>} : vector<16x8xf32>, vector<16x8xf32>, vector<16x16xf32> -> vector<16x16xf32>
    %56 = arith.addf %55, %6 : vector<16x16xf32>
    %cst_20 = arith.constant dense<0xFF800000> : vector<16xf32>
    %57 = vector.multi_reduction <maximumf>, %56, %cst_20 [1] : vector<16x16xf32> to vector<16xf32>
    %58 = vector.shape_cast %57 : vector<16xf32> to vector<16x1xf32>
    %59 = vector.broadcast %58 : vector<16x1xf32> to vector<16x16xf32>
    %60 = arith.subf %56, %59 : vector<16x16xf32>
    %61 = math.exp %60 : vector<16x16xf32>
    %cst_21 = arith.constant dense<0.000000e+00> : vector<16xf32>
    %62 = vector.multi_reduction <add>, %61, %cst_21 [1] : vector<16x16xf32> to vector<16xf32>
    %63 = vector.shape_cast %62 : vector<16xf32> to vector<16x1xf32>
    %cst_22 = arith.constant dense<0.000000e+00> : vector<16x8xf32>
    %64 = tpu.matmul %61, %54, %cst_22 {dimension_numbers = #tpu.dot_dimension_numbers<[1], [0], [0], [1], [0, 0, 1, 1], [], []>, precision = #tpu.contract_precision<fp32>} : vector<16x16xf32>, vector<16x8xf32>, vector<16x8xf32> -> vector<16x8xf32>
    %65 = vector.broadcast %63 : vector<16x1xf32> to vector<16x8xf32>
    %66 = arith.divf %64, %65 : vector<16x8xf32>
    %67 = tpu.concatenate %21, %36, %51, %66 in 1 : vector<16x8xf32>, vector<16x8xf32>, vector<16x8xf32>, vector<16x8xf32> -> vector<16x32xf32>
    %c0_23 = arith.constant 0 : index
    %c0_24 = arith.constant 0 : index
    %68 = vector.load %arg4[%c0_23, %c0_24] : memref<32x32xf32, #tpu.memory_space<vmem>>, vector<32x32xf32>
    %cst_25 = arith.constant dense<0.000000e+00> : vector<16x32xf32>
    %69 = tpu.matmul %67, %68, %cst_25 {dimension_numbers = #tpu.dot_dimension_numbers<[1], [0], [0], [1], [0, 0, 1, 1], [], []>, precision = #tpu.contract_precision<fp32>} : vector<16x32xf32>, vector<32x32xf32>, vector<16x32xf32> -> vector<16x32xf32>
    %c0_26 = arith.constant 0 : index
    %c0_27 = arith.constant 0 : index
    %70 = vector.load %arg5[%c0_26, %c0_27] : memref<1x32xf32, #tpu.memory_space<vmem>>, vector<1x32xf32>
    %71 = vector.broadcast %70 : vector<1x32xf32> to vector<16x32xf32>
    %72 = arith.addf %69, %71 : vector<16x32xf32>
    %c0_28 = arith.constant 0 : index
    %c0_29 = arith.constant 0 : index
    %73 = vector.load %arg7[%c0_28, %c0_29] : memref<16x32xf32, #tpu.memory_space<vmem>>, vector<16x32xf32>
    tpu.vector_store %arg7[%c0_28, %c0_29], %72 {strides = array<i32>} : memref<16x32xf32, #tpu.memory_space<vmem>>, vector<16x32xf32>,
    return
  }
  func.func @transform_0(%arg0: i32) -> (i32, i32) {
    %c0_i32 = arith.constant 0 : i32
    %c0_i32_0 = arith.constant 0 : i32
    %c0_i32_1 = arith.constant 0 : i32
    return %c0_i32, %c0_i32_0 : i32, i32
  }
  func.func @transform_1(%arg0: i32) -> (i32, i32) {
    %c0_i32 = arith.constant 0 : i32
    %c0_i32_0 = arith.constant 0 : i32
    %c0_i32_1 = arith.constant 0 : i32
    return %c0_i32, %c0_i32_0 : i32, i32
  }
  func.func @transform_2(%arg0: i32) -> (i32, i32) {
    %c0_i32 = arith.constant 0 : i32
    %c0_i32_0 = arith.constant 0 : i32
    %c0_i32_1 = arith.constant 0 : i32
    return %c0_i32, %c0_i32_0 : i32, i32
  }
  func.func @transform_3(%arg0: i32) -> (i32, i32) {
    %c0_i32 = arith.constant 0 : i32
    %c0_i32_0 = arith.constant 0 : i32
    %c0_i32_1 = arith.constant 0 : i32
    return %c0_i32, %c0_i32_0 : i32, i32
  }
  func.func @transform_4(%arg0: i32) -> (i32, i32) {
    %c0_i32 = arith.constant 0 : i32
    %c0_i32_0 = arith.constant 0 : i32
    %c0_i32_1 = arith.constant 0 : i32
    return %c0_i32, %c0_i32_0 : i32, i32
  }
  func.func @transform_5(%arg0: i32) -> (i32, i32) {
    %c0_i32 = arith.constant 0 : i32
    %c0_i32_0 = arith.constant 0 : i32
    %c0_i32_1 = arith.constant 0 : i32
    return %c0_i32, %c0_i32_0 : i32, i32
  }
  func.func @transform_6(%arg0: i32) -> (i32, i32) {
    %c0_i32 = arith.constant 0 : i32
    %c0_i32_0 = arith.constant 0 : i32
    %c0_i32_1 = arith.constant 0 : i32
    return %c0_i32, %c0_i32_0 : i32, i32
  }
}

</mosaic_0001>

<bundles_post_ra>
// kernel: tpu_custom_call.1
= control target key start
LH: loop header
LB: loop body
LE: loop exit
PB: predicated region body
PF: predicated region fallthrough
CT: control target
= control target key end

     0   :  { %11 = vsyncpa [#allocation3], 0  ;;  %s6916_s0 = inlined_call_operand.hbm [shape: f32[16,32], index: 0, kind: input, shape index: {}]   ;;  %s6917_s1 = inlined_call_operand.hbm [shape: f32[32,96], index: 1, kind: input, shape index: {}]   ;;  %s6918_s2 = inlined_call_operand.vmem [shape: f32[1,96], index: 2, kind: input, shape index: {}]   ;;  %s6919_s3 = inlined_call_operand.hbm [shape: f32[32,32], index: 3, kind: input, shape index: {}]   ;;  %s6920_s4 = inlined_call_operand.vmem [shape: f32[1,32], index: 4, kind: input, shape index: {}]   ;;  %s6921_s5 = inlined_call_operand.hbm [shape: f32[16,16], index: 5, kind: input, shape index: {}]   ;;  %s6922_s6 = inlined_call_operand.hbm [shape: f32[16,32], index: 6, kind: output, shape index: {}]  }
   0x1   :  { %12 = vsyncpa [#allocation6], 0 }
   0x2   :  { %13 = vsyncpa [#allocation9], 0 }
   0x3   :  { %14 = vsyncpa [#allocation4], 0  ;;  %s6338_s21 = smov [#allocation5]   ;;  %s6339_s23 = smov [#allocation2]  }
   0x4   :  { %s32_s22 = sshll.u32 %s6338_s21, 4  ;;  %s20_s24 = sshll.u32 %s6339_s23, 4  ;;  %s33_s22 = int_to_ptr.vmem [resolvable:$true] %s32_s22  ;;  %s21_s24 = int_to_ptr.vmem [resolvable:$true] %s20_s24 }
   0x5   :  { %s6238_s25 = scalar_lea.vmem %s33_s22, 512  ;;  %p6243_p1 = scmp.lt.s32.totalorder %s33_s22, %s33_s22 }
   0x6   :  { %p6239_p0 = scmp.ne.s32.totalorder %s33_s22, %s6238_s25  ;;  %p6244_p2 = scmp.lt.s32.totalorder %s6238_s25, %s6238_s25 }
   0x8   :  { %p6245_p3 = por %p6244_p2, %p6243_p1 }
   0xa   :  { %p6246_p4 = pnand %p6245_p3, %p6239_p0 }
   0xc   :  { %6249 = shalt.err (!%p6246_p4)
}
   0xd   :  { %s6340_s26 = smov 128   ;;  %s6341_s27 = smov 8  }
   0xe   :  { %38 = dma.hbm_to_vmem [thread:$0]  %s6917_s1, 512, %s33_s22, [#allocation6], %s6340_s26, %s6340_s26, %s6341_s27  }
   0xf   :  { %s6258_s30 = scalar_lea.vmem %s21_s24, 256  ;;  %p6263_p6 = scmp.lt.s32.totalorder %s21_s24, %s21_s24 }
  0x10   :  { %p6259_p5 = scmp.ne.s32.totalorder %s21_s24, %s6258_s30  ;;  %p6264_p7 = scmp.lt.s32.totalorder %s6258_s30, %s6258_s30 }
  0x12   :  { %p6265_p8 = por %p6264_p7, %p6263_p6 }
  0x14   :  { %p6266_p9 = pnand %p6265_p8, %p6259_p5 }
  0x16   :  { %6269 = shalt.err (!%p6266_p9)
}
  0x17   :  { %26 = dma.hbm_to_vmem [thread:$0]  %s6916_s0, 256, %s21_s24, [#allocation3], %s6340_s26, %s6340_s26, %s6341_s27  }
  0x18   :  { %s6342_s9 = smov [#allocation7]   ;;  %s6343_s11 = smov [#allocation8]  }
  0x19   :  { %s46_s10 = sshll.u32 %s6342_s9, 4  ;;  %s60_s12 = sshll.u32 %s6343_s11, 4  ;;  %s47_s10 = int_to_ptr.vmem [resolvable:$true] %s46_s10  ;;  %s61_s12 = int_to_ptr.vmem [resolvable:$true] %s60_s12 }
  0x1a   :  { %s6278_s1 = scalar_lea.vmem %s47_s10, 512  ;;  %p6283_p11 = scmp.lt.s32.totalorder %s47_s10, %s47_s10 }
  0x1b   :  { %p6279_p10 = scmp.ne.s32.totalorder %s47_s10, %s6278_s1  ;;  %p6284_p12 = scmp.lt.s32.totalorder %s6278_s1, %s6278_s1 }
  0x1d   :  { %p6285_p13 = por %p6284_p12, %p6283_p11 }
  0x1f   :  { %p6286_p0 = pnand %p6285_p13, %p6279_p10 }
  0x21   :  { %6289 = shalt.err (!%p6286_p0)
}
  0x22   :  { %52 = dma.hbm_to_vmem [thread:$0]  %s6919_s3, 512, %s47_s10, [#allocation6], %s6340_s26, %s6340_s26, %s6341_s27  }
  0x23   :  { %s6298_s0 = scalar_lea.vmem %s61_s12, 256  ;;  %p6303_p2 = scmp.lt.s32.totalorder %s61_s12, %s61_s12 }
  0x24   :  { %p6299_p1 = scmp.ne.s32.totalorder %s61_s12, %s6298_s0  ;;  %p6304_p3 = scmp.lt.s32.totalorder %s6298_s0, %s6298_s0 }
  0x26   :  { %p6305_p4 = por %p6304_p3, %p6303_p2 }
  0x28   :  { %p6306_p5 = pnand %p6305_p4, %p6299_p1 }
  0x2a   :  { %6309 = shalt.err (!%p6306_p5)
}
  0x2b   :  { %66 = dma.hbm_to_vmem [thread:$0]  %s6921_s5, 256, %s61_s12, [#allocation9], %s6340_s26, %s6340_s26, %s6341_s27  }
  0x2c   :  { %6330 = dma.done.wait [#allocation3], 256  }
  0x2d   :  { %6331 = vsyncadd [#allocation3], 4294967040 }
  0x2e   :  { %6332 = dma.done.wait [#allocation6], 1024  }
  0x2f   :  { %6333 = vsyncadd [#allocation6], 4294966272 }
  0x30   :  { %6334 = dma.done.wait [#allocation9], 256  }
  0x31   :  { %6335 = vsyncadd [#allocation9], 4294967040  ;;  %vm92_vm0 = vcmask 261120   ;;  %v84_v0 = vld [vmem:[#allocation5 + $0x18] sm:$0xff]  ;;  %v83_v1 = vld [vmem:[#allocation5 + $0x10] sm:$0xff]  ;;  %vm635_vm1 = vcmask 64512  }
  0x32   :  { %v82_v2 = vld [vmem:[#allocation5 + $0x8] sm:$0xff]  ;;  %v6417_v3 = vand.u32 4294901760, %v84_v0  ;;  %v6419_v4 = vand.u32 4294901760, %v83_v1  ;;  %v81_v6 = vld [vmem:[#allocation5] sm:$0xff]  ;;  %v79_v7 = vld [vmem:[#allocation2] sm:$0xff]  ;;  %s6345_s17 = smov 64  }
  0x33   :  { %v6421_v5 = vand.u32 4294901760, %v82_v2  ;;  %v80_v8 = vld [vmem:[#allocation2 + $0x8] sm:$0xff]  ;;  %v6423_v9 = vand.u32 4294901760, %v81_v6  ;;  %v94_v10 = vsel %vm92_vm0, %v79_v7, 0  ;;  %v5442_v39 = vld [vmem:[%s6918_s2] ss:$0 sm:$0xff] }
  0x34   :  { %v97_v11 = vsel %vm92_vm0, %v80_v8, 0  ;;  %5708 = vmatprep.subr.mxu0 %v6417_v3  ;;  %v214_v12 = vsub.f32 %v84_v0, %v6417_v3  ;;  %v6429_v13 = vand.u32 4294901760, %v94_v10  ;;  %v221_v14 = vsub.f32 %v83_v1, %v6419_v4  ;;  %s6344_s2 = smov 96   ;;  %s6346_s18 = smov 88  }
  0x35   :  { %v6432_v15 = vand.u32 4294901760, %v97_v11  ;;  %5709 = vmatpush3.msra.mxu0 %v6417_v3  ;;  %v228_v16 = vsub.f32 %v82_v2, %v6421_v5  ;;  %v235_v17 = vsub.f32 %v81_v6, %v6423_v9  ;;  %s6347_s19 = smov 120   ;;  %vm1146_vm2 = vcmask 130048   ;;  %s6348_s20 = smov 56  }
  0x36   :  { %5710 = vmatprep.subr.mxu0 %v6419_v4  ;;  %v215_v18 = vand.u32 4294901760, %v214_v12  ;;  %v169_v19 = vsub.f32 %v94_v10, %v6429_v13  ;;  %v222_v20 = vand.u32 4294901760, %v221_v14  ;;  %5727 = vmatprep.mubr.f32.mxu1 %v6429_v13  ;;  %s6349_s21 = smov 80   ;;  %s6350_s22 = smov 112   ;;  %vm4873_vm3 = vcmask 195584  }
  0x37   :  { %v179_v21 = vsub.f32 %v97_v11, %v6432_v15  ;;  %5711 = vmatpush3.msra.mxu0 %v6419_v4  ;;  %v229_v22 = vand.u32 4294901760, %v228_v16  ;;  %v236_v23 = vand.u32 4294901760, %v235_v17  ;;  %s6351_s23 = smov 48   ;;  %s6352_s24 = smov 72  }
  0x38   :  { %5712 = vmatprep.subr.mxu0 %v6421_v5  ;;  %v216_v24 = vsub.f32 %v214_v12, %v215_v18  ;;  %v170_v25 = vand.u32 4294901760, %v169_v19  ;;  %v223_v26 = vsub.f32 %v221_v14, %v222_v20  ;;  %s6353_s25 = smov 104   ;;  %s6354_s28 = smov 40  }
  0x39   :  { %v180_v27 = vand.u32 4294901760, %v179_v21  ;;  %5713 = vmatpush3.msra.mxu0 %v6421_v5  ;;  %v230_v28 = vsub.f32 %v228_v16, %v229_v22  ;;  %v237_v29 = vsub.f32 %v235_v17, %v236_v23  ;;  %s6355_s29 = smov 16   ;;  %s6356_s30 = smov 24  }
  0x3a   :  { %5714 = vmatprep.subr.mxu0 %v6423_v9  ;;  %v217_v30 = vand.u32 4294901760, %v216_v24  ;;  %v171_v31 = vsub.f32 %v169_v19, %v170_v25  ;;  %v224_v32 = vand.u32 4294901760, %v223_v26 }
  0x3b   :  { %v181_v33 = vsub.f32 %v179_v21, %v180_v27  ;;  %5715 = vmatpush3.msra.mxu0 %v6423_v9  ;;  %v231_v36 = vand.u32 4294901760, %v230_v28  ;;  %v238_v37 = vand.u32 4294901760, %v237_v29 }
  0x3c   :  { %5719 = vmatprep.subr.mxu1 %v217_v30  ;;  %v172_v34 = vand.u32 4294901760, %v171_v31  ;;  %5730 = vmatprep.subr.mxu0 %v214_v12 }
  0x3d   :  { %v182_v35 = vand.u32 4294901760, %v181_v33  ;;  %5720 = vmatpush3.msra.mxu1 %v217_v30 }
  0x3e   :  { %5716 = vmatprep.mubr.f32.mxu0 %v172_v34  ;;  %5721 = vmatprep.subr.mxu1 %v224_v32 }
  0x3f   :  { %5717 = vmatmul.mubr.f32.vlgmr.msra.gmra.mxu0 %v182_v35  ;;  %5722 = vmatpush3.msra.mxu1 %v224_v32  ;;  %v6506_v32 = vld [vmem:[#allocation8 + $0x8] sm:$0xff]  ;;  %v6508_v35 = vld [vmem:[#allocation8] sm:$0xff] }
  0x40   :  { %5731 = vmatpush3.msra.mxu0 %v214_v12  ;;  %5723 = vmatprep.subr.mxu1 %v231_v36 }
  0x41   :  { %5732 = vmatprep.subr.mxu0 %v221_v14  ;;  %5724 = vmatpush3.msra.mxu1 %v231_v36 }
  0x42   :  { %5733 = vmatpush3.msra.mxu0 %v221_v14  ;;  %5725 = vmatprep.subr.mxu1 %v238_v37 }
  0x43   :  { %5734 = vmatprep.subr.mxu0 %v228_v16  ;;  %5726 = vmatpush3.msra.mxu1 %v238_v37 }
  0x44   :  { %5735 = vmatpush3.msra.mxu0 %v228_v16  ;;  %5728 = vmatmul.mubr.f32.vlgmr.msra.gmra.mxu1 %v6432_v15 }
  0x45   :  { %5736 = vmatprep.subr.mxu0 %v235_v17  ;;  %5741 = vmatprep.subr.mxu1 %v6417_v3 }
  0x46   :  { %5737 = vmatpush3.msra.mxu0 %v235_v17  ;;  %5738 = vmatprep.mubr.f32.mxu0 %v169_v19 }
  0x47   :  { %5742 = vmatpush3.msra.mxu1 %v6417_v3  ;;  %5739 = vmatmul.mubr.f32.vlgmr.msra.gmra.mxu0 %v179_v21 }
  0x48   :  { %5743 = vmatprep.subr.mxu1 %v6419_v4  ;;  %5752 = vmatprep.subr.mxu0 %v215_v18 }
  0x49   :  { %5744 = vmatpush3.msra.mxu1 %v6419_v4  ;;  %5753 = vmatpush3.msra.mxu0 %v215_v18 }
  0x4a   :  { %5745 = vmatprep.subr.mxu1 %v6421_v5  ;;  %5754 = vmatprep.subr.mxu0 %v222_v20 }
  0x4b   :  { %5746 = vmatpush3.msra.mxu1 %v6421_v5  ;;  %5755 = vmatpush3.msra.mxu0 %v222_v20 }
  0x4c   :  { %5747 = vmatprep.subr.mxu1 %v6423_v9  ;;  %5756 = vmatprep.subr.mxu0 %v229_v22 }
  0x4d   :  { %5748 = vmatpush3.msra.mxu1 %v6423_v9  ;;  %5749 = vmatprep.mubr.f32.mxu1 %v170_v25 }
  0x4e   :  { %5757 = vmatpush3.msra.mxu0 %v229_v22  ;;  %5750 = vmatmul.mubr.f32.vlgmr.msra.gmra.mxu1 %v180_v27 }
  0x4f   :  { %5758 = vmatprep.subr.mxu0 %v236_v23  ;;  %5763 = vmatprep.subr.mxu1 %v6417_v3 }
  0x50   :  { %5759 = vmatpush3.msra.mxu0 %v236_v23  ;;  %5760 = vmatprep.mubr.f32.mxu0 %v6429_v13 }
  0x51   :  { %5764 = vmatpush3.msra.mxu1 %v6417_v3  ;;  %5761 = vmatmul.mubr.f32.vlgmr.msra.gmra.mxu0 %v6432_v15 }
  0x52   :  { %5765 = vmatprep.subr.mxu1 %v6419_v4  ;;  %5771 = vmatprep.mubr.f32.mxu1 %v6429_v13 }
  0x53   :  { %5766 = vmatpush3.msra.mxu1 %v6419_v4 }
  0x54   :  { %5767 = vmatprep.subr.mxu1 %v6421_v5 }
  0x55   :  { %5768 = vmatpush3.msra.mxu1 %v6421_v5 }
  0x56   :  { %5769 = vmatprep.subr.mxu1 %v6423_v9 }
  0x57   :  { %5770 = vmatpush3.msra.mxu1 %v6423_v9 }
  0x58   :  { %5772 = vmatmul.mubr.f32.vlgmr.msra.gmra.mxu1 %v6432_v15 }
  0xff   :  { %v5718_v38 = vpop.f32.mrf.mxu0 }
 0x100   :  { %v185_v42 = vadd.f32 %v5718_v38, %v5442_v39 }
 0x101   :  { %v174_v40 = vpop.f32.mrf.mxu0 }
 0x102   :  { %v175_v43 = vadd.f32 %v5442_v39, %v174_v40 }
 0x104   :  { %v5729_v41 = vpop.f32.mrf.mxu1 }
 0x105   :  { %v282_v46 = vadd.f32 %v5729_v41, %v185_v42 }
 0x106   :  { %v275_v44 = vpop.f32.mrf.mxu1 }
 0x107   :  { %v5740_v45 = vpop.f32.mrf.mxu0  ;;  %v276_v48 = vadd.f32 %v275_v44, %v175_v43 }
 0x108   :  { %v369_v50 = vadd.f32 %v5740_v45, %v282_v46 }
 0x109   :  { %v361_v49 = vpop.f32.mrf.mxu0 }
 0x10a   :  { %v362_v53 = vadd.f32 %v361_v49, %v276_v48 }
 0x10e   :  { %v5751_v47 = vpop.f32.mrf.mxu1 }
 0x10f   :  { %v454_v54 = vadd.f32 %v5751_v47, %v369_v50 }
 0x110   :  { %v445_v51 = vpop.f32.mrf.mxu1 }
 0x111   :  { %v5762_v52 = vpop.f32.mrf.mxu0  ;;  %v446_v55 = vadd.f32 %v445_v51, %v362_v53 }
 0x112   :  { %v543_v57 = vadd.f32 %v5762_v52, %v454_v54 }
 0x113   :  { %v536_v56 = vpop.f32.mrf.mxu0 }
 0x114   :  { %v537_v59 = vadd.f32 %v536_v56, %v446_v55 }
 0x118   :  { %v5773_v58 = vpop.f32.mrf.mxu1 }
 0x119   :  { %v6470_v60 = vadd.f32 %v5773_v58, %v543_v57 }
 0x11a   :  { %v617_v61 = vpop.f32.mrf.mxu1 }
 0x11b   :  { %v6472_v62 = vadd.f32 %v617_v61, %v537_v59  ;;  %633 = vrot.lane.b32.xlu0 %v6470_v60, %s6344_s2  ;;  %v638_v5 = vsel %vm635_vm1, %v6470_v60, 0 }
 0x11c   :  { %v721_v6 = vand.u32 4294901760, %v638_v5 }
 0x11d   :  { %v636_v63 = vsel %vm635_vm1, %v6472_v62, 0 }
 0x11e   :  { %v6477_v0 = vand.u32 4294901760, %v636_v63  ;;  %v722_v7 = vsub.f32 %v638_v5, %v721_v6 }
 0x11f   :  { %631 = vrot.lane.b32.xlu0 %v6472_v62, %s6344_s2 }
 0x120   :  { %5785 = vmatprep.mubr.f32.mxu1 %v6477_v0  ;;  %v712_v1 = vsub.f32 %v636_v63, %v6477_v0  ;;  %v723_v11 = vand.u32 4294901760, %v722_v7 }
 0x122   :  { %v713_v2 = vand.u32 4294901760, %v712_v1  ;;  %v724_v17 = vsub.f32 %v722_v7, %v723_v11 }
 0x123   :  { %1167 = vrot.lane.b32.xlu0 %v6470_v60, %s6345_s17 }
 0x124   :  { %v714_v3 = vsub.f32 %v712_v1, %v713_v2  ;;  %v725_v21 = vand.u32 4294901760, %v724_v17 }
 0x126   :  { %v715_v4 = vand.u32 4294901760, %v714_v3 }
 0x127   :  { %1689 = vrot.lane.b32.xlu0 %v6470_v60, %s6346_s18 }
 0x128   :  { %5778 = vmatprep.mubr.f32.mxu0 %v715_v4 }
 0x12b   :  { %1687 = vrot.lane.b32.xlu0 %v6472_v62, %s6346_s18 }
 0x12f   :  { %1683 = vrot.lane.b32.xlu0 %v6472_v62, %s6347_s19 }
 0x133   :  { %1685 = vrot.lane.b32.xlu0 %v6470_v60, %s6347_s19 }
 0x18d   :  { %v634_v8 = vpop.permute.xlu0 %633 }
 0x18e   :  { %v642_v9 = vsel %vm635_vm1, %v634_v8, 0 }
 0x18f   :  { %v673_v10 = vand.u32 4294901760, %v642_v9 }
 0x191   :  { %v761_v12 = vsub.f32 %v642_v9, %v673_v10  ;;  %5774 = vmatprep.subr.mxu0 %v673_v10  ;;  %v632_v13 = vpop.permute.xlu0 %631 }
 0x192   :  { %v640_v14 = vsel %vm635_vm1, %v632_v13, 0  ;;  %5775 = vmatpush3.xpose.msra.mxu0 %v673_v10 }
 0x193   :  { %v676_v15 = vand.u32 4294901760, %v640_v14  ;;  %v762_v16 = vand.u32 4294901760, %v761_v12 }
 0x195   :  { %v768_v18 = vsub.f32 %v640_v14, %v676_v15  ;;  %5776 = vmatprep.subr.mxu0 %v676_v15  ;;  %v763_v19 = vsub.f32 %v761_v12, %v762_v16  ;;  %v1168_v24 = vpop.permute.xlu0 %1167 }
 0x196   :  { %5777 = vmatpush3.xpose.msra.mxu0 %v676_v15  ;;  %v6492_v26 = vand.u32 4294901760, %v1168_v24 }
 0x197   :  { %5788 = vmatprep.subr.mxu0 %v761_v12  ;;  %v764_v20 = vand.u32 4294901760, %v763_v19  ;;  %v769_v22 = vand.u32 4294901760, %v768_v18 }
 0x198   :  { %v6495_v27 = vsub.f32 %v1168_v24, %v6492_v26 }
 0x199   :  { %5781 = vmatprep.subr.mxu1 %v764_v20  ;;  %5779 = vmatmul.mubr.f32.vlgmr.msra.gmra.mxu0 %v725_v21  ;;  %v770_v23 = vsub.f32 %v768_v18, %v769_v22  ;;  %v1690_v3 = vpop.permute.xlu0 %1689 }
 0x19a   :  { %5782 = vmatpush3.xpose.msra.mxu1 %v764_v20  ;;  %5789 = vmatpush3.xpose.msra.mxu0 %v761_v12  ;;  %v6499_v28 = vand.u32 4294901760, %v6495_v27  ;;  %v1697_v8 = vsel %vm635_vm1, %v1690_v3, 0 }
 0x19b   :  { %5792 = vmatprep.mubr.f32.mxu0 %v712_v1  ;;  %5790 = vmatprep.subr.mxu0 %v768_v18  ;;  %v771_v25 = vand.u32 4294901760, %v770_v23 }
 0x19c   :  { %v1296_v29 = vsub.f32 %v6495_v27, %v6499_v28 }
 0x19d   :  { %5783 = vmatprep.subr.mxu1 %v771_v25  ;;  %v1688_v9 = vpop.permute.xlu0 %1687 }
 0x19e   :  { %5784 = vmatpush3.xpose.msra.mxu1 %v771_v25  ;;  %5791 = vmatpush3.xpose.msra.mxu0 %v768_v18  ;;  %v1297_v30 = vand.u32 4294901760, %v1296_v29  ;;  %v1695_v12 = vsel %vm635_vm1, %v1688_v9, 0 }
 0x19f   :  { %5795 = vmatprep.subr.mxu1 %v673_v10  ;;  %5802 = vmatprep.subr.mxu0 %v762_v16 }
 0x1a1   :  { %5786 = vmatmul.mubr.f32.vlgmr.msra.gmra.mxu1 %v721_v6  ;;  %5793 = vmatmul.mubr.f32.vlgmr.msra.gmra.mxu0 %v722_v7  ;;  %v1684_v21 = vpop.permute.xlu0 %1683 }
 0x1a2   :  { %5796 = vmatpush3.xpose.msra.mxu1 %v673_v10  ;;  %5799 = vmatprep.mubr.f32.mxu1 %v713_v2 }
 0x1a3   :  { %5803 = vmatpush3.xpose.msra.mxu0 %v762_v16  ;;  %5806 = vmatprep.mubr.f32.mxu0 %v6477_v0  ;;  %v6532_v16 = vand.u32 4294901760, %v1695_v12 }
 0x1a4   :  { %5797 = vmatprep.subr.mxu1 %v676_v15  ;;  %5804 = vmatprep.subr.mxu0 %v769_v22 }
 0x1a5   :  { %v6546_v23 = vsub.f32 %v1695_v12, %v6532_v16 }
 0x1a6   :  { %5798 = vmatpush3.xpose.msra.mxu1 %v676_v15 }
 0x1a7   :  { %5805 = vmatpush3.xpose.msra.mxu0 %v769_v22  ;;  %5809 = vmatprep.subr.mxu1 %v673_v10 }
 0x1a8   :  { %5816 = vmatprep.subr.mxu0 %v6492_v26 }
 0x1a9   :  { %5800 = vmatmul.mubr.f32.vlgmr.msra.gmra.mxu1 %v723_v11  ;;  %v6525_v11 = vand.u32 4294901760, %v1697_v8 }
 0x1aa   :  { %5807 = vmatmul.mubr.f32.vlgmr.msra.gmra.mxu0 %v721_v6  ;;  %5810 = vmatpush3.xpose.msra.mxu1 %v673_v10 }
 0x1ab   :  { %5813 = vmatprep.mubr.f32.mxu1 %v6477_v0  ;;  %5817 = vmatpush3.msra.mxu0 %v6492_v26  ;;  %v6537_v18 = vsub.f32 %v1697_v8, %v6525_v11 }
 0x1ac   :  { %5811 = vmatprep.subr.mxu1 %v676_v15 }
 0x1ad   :  { %v6549_v29 = vand.u32 4294901760, %v6537_v18 }
 0x1ae   :  { %5812 = vmatpush3.xpose.msra.mxu1 %v676_v15 }
 0x1af   :  { %5823 = vmatprep.subr.mxu1 %v1297_v30 }
 0x1b1   :  { %5814 = vmatmul.mubr.f32.vlgmr.msra.gmra.mxu1 %v721_v6 }
 0x1b2   :  { %5824 = vmatpush3.msra.mxu1 %v1297_v30  ;;  %v1691_v30 = vsel %vm635_vm1, %v1684_v21, 0 }
 0x259   :  { %v5780_v31 = vpop.f32.mrf.mxu0 }
 0x25a   :  { %v728_v36 = vadd.f32 %v5780_v31, %v6506_v32 }
 0x25b   :  { %v717_v34 = vpop.f32.mrf.mxu0 }
 0x25c   :  { %v718_v38 = vadd.f32 %v717_v34, %v6508_v35  ;;  %v6555_v34 = vand.u32 4294901760, %v6546_v23 }
 0x261   :  { %v5787_v33 = vpop.f32.mrf.mxu1  ;;  %v5794_v40 = vpop.f32.mrf.mxu0 }
 0x262   :  { %v815_v39 = vadd.f32 %v5787_v33, %v728_v36  ;;  %v6557_v36 = vand.u32 4294901760, %v1691_v30 }
 0x263   :  { %v808_v37 = vpop.f32.mrf.mxu1  ;;  %v890_v44 = vpop.f32.mrf.mxu0 }
 0x264   :  { %v809_v41 = vadd.f32 %v808_v37, %v718_v38  ;;  %v898_v43 = vadd.f32 %v5794_v40, %v815_v39  ;;  %v1686_v37 = vpop.permute.xlu0 %1685  ;;  %v1818_v38 = vsub.f32 %v6537_v18, %v6549_v29 }
 0x266   :  { %v891_v46 = vadd.f32 %v890_v44, %v809_v41  ;;  %v1693_v41 = vsel %vm635_vm1, %v1686_v37, 0  ;;  %v1767_v44 = vsub.f32 %v1691_v30, %v6557_v36 }
 0x269   :  { %v5801_v42 = vpop.f32.mrf.mxu1 }
 0x26a   :  { %v981_v47 = vadd.f32 %v5801_v42, %v898_v43  ;;  %v5808_v48 = vpop.f32.mrf.mxu0  ;;  %v1825_v43 = vsub.f32 %v6546_v23, %v6555_v34 }
 0x26b   :  { %v972_v45 = vpop.f32.mrf.mxu1 }
 0x26c   :  { %v973_v49 = vadd.f32 %v972_v45, %v891_v46  ;;  %v1064_v50 = vadd.f32 %v5808_v48, %v981_v47  ;;  %v1057_v51 = vpop.f32.mrf.mxu0  ;;  %v1819_v45 = vand.u32 4294901760, %v1818_v38  ;;  %v1776_v47 = vand.u32 4294901760, %v1693_v41 }
 0x26d   :  { %v1768_v48 = vand.u32 4294901760, %v1767_v44 }
 0x26e   :  { %v1058_v53 = vadd.f32 %v1057_v51, %v973_v49  ;;  %v1777_v49 = vsub.f32 %v1693_v41, %v1776_v47 }
 0x271   :  { %v5815_v52 = vpop.f32.mrf.mxu1 }
 0x272   :  { %v1143_v54 = vadd.f32 %v5815_v52, %v1064_v50  ;;  %v1778_v50 = vand.u32 4294901760, %v1777_v49 }
 0x273   :  { %v1136_v55 = vpop.f32.mrf.mxu1 }
 0x274   :  { %v1137_v56 = vadd.f32 %v1136_v55, %v1058_v53  ;;  %v1150_v57 = vsel %vm1146_vm2, %v1143_v54, -inf }
 0x275   :  { %1151 = vmax.xlane.f32.xlu1 %v1150_v57 }
 0x276   :  { %v1147_v58 = vsel %vm1146_vm2, %v1137_v56, -inf }
 0x279   :  { %1148 = vmax.xlane.f32.xlu1 %v1147_v58 }
 0x28a   :  { %1165 = vrot.lane.b32.xlu1 %v6472_v62, %s6345_s17 }
 0x2fe   :  { %v1152_v59 = vpop.xlane.xlu1 %1151 }
 0x2ff   :  { %v1154_v61 = vsub.f32 %v1143_v54, %v1152_v59 }
 0x301   :  { %v1157_v63 = vmul.f32 1.442695, %v1154_v61 }
 0x302   :  { %v1149_v0 = vpop.xlane.xlu1 %1148 }
 0x303   :  { %6196 = vpow2.f32 %v1157_v63  ;;  %v1153_v1 = vsub.f32 %v1137_v56, %v1149_v0 }
 0x305   :  { %v1155_v2 = vmul.f32 1.442695, %v1153_v1 }
 0x306   :  { %v1166_v4 = vpop.permute.xlu1 %1165 }
 0x307   :  { %6198 = vpow2.f32 %v1155_v2  ;;  %v1209_v5 = vand.u32 4294901760, %v1166_v4 }
 0x309   :  { %v6516_v6 = vsub.f32 %v1166_v4, %v1209_v5  ;;  %5818 = vmatprep.subr.mxu0 %v1209_v5 }
 0x30a   :  { %5819 = vmatpush3.msra.mxu0 %v1209_v5 }
 0x30b   :  { %5830 = vmatprep.subr.mxu0 %v6495_v27  ;;  %v6520_v7 = vand.u32 4294901760, %v6516_v6 }
 0x30d   :  { %v1303_v10 = vsub.f32 %v6516_v6, %v6520_v7 }
 0x30f   :  { %v1304_v13 = vand.u32 4294901760, %v1303_v10 }
 0x310   :  { %v6528_v14 = vpop.eup %6196 }
 0x311   :  { %5825 = vmatprep.subr.mxu1 %v1304_v13  ;;  %v1175_v15 = vsel %vm1146_vm2, %v6528_v14, 0 }
 0x312   :  { %5826 = vmatpush3.msra.mxu1 %v1304_v13  ;;  %v6534_v17 = vand.u32 4294901760, %v1175_v15 }
 0x313   :  { %5837 = vmatprep.subr.mxu1 %v6492_v26 }
 0x314   :  { %v6540_v19 = vpop.eup %6198  ;;  %v1255_v20 = vsub.f32 %v1175_v15, %v6534_v17 }
 0x315   :  { %v1172_v22 = vsel %vm1146_vm2, %v6540_v19, 0 }
 0x316   :  { %v1244_v24 = vand.u32 4294901760, %v1172_v22  ;;  %v1256_v25 = vand.u32 4294901760, %v1255_v20 }
 0x318   :  { %5827 = vmatprep.mubr.f32.mxu1 %v1244_v24  ;;  %v1245_v31 = vsub.f32 %v1172_v22, %v1244_v24  ;;  %v1257_v39 = vsub.f32 %v1255_v20, %v1256_v25 }
 0x319   :  { %5828 = vmatmul.mubr.f32.vlgmr.msra.gmra.mxu1 %v6534_v17 }
 0x31a   :  { %5838 = vmatpush3.msra.mxu1 %v6492_v26  ;;  %v1246_v33 = vand.u32 4294901760, %v1245_v31  ;;  %v1258_v46 = vand.u32 4294901760, %v1257_v39 }
 0x31b   :  { %5839 = vmatprep.subr.mxu1 %v1209_v5 }
 0x31c   :  { %5840 = vmatpush3.msra.mxu1 %v1209_v5  ;;  %5841 = vmatprep.mubr.f32.mxu1 %v1246_v33  ;;  %v1247_v40 = vsub.f32 %v1245_v31, %v1246_v33 }
 0x31d   :  { %5851 = vmatprep.subr.mxu1 %v6492_v26  ;;  %5842 = vmatmul.mubr.f32.vlgmr.msra.gmra.mxu1 %v1256_v25 }
 0x31e   :  { %5852 = vmatpush3.msra.mxu1 %v6492_v26  ;;  %5855 = vmatprep.mubr.f32.mxu1 %v1244_v24  ;;  %v1248_v42 = vand.u32 4294901760, %v1247_v40  ;;  %v1826_v26 = vand.u32 4294901760, %v1825_v43 }
 0x31f   :  { %5853 = vmatprep.subr.mxu1 %v1209_v5 }
 0x320   :  { %5854 = vmatpush3.msra.mxu1 %v1209_v5  ;;  %5820 = vmatprep.mubr.f32.mxu0 %v1248_v42 }
 0x321   :  { %5865 = vmatprep.subr.mxu1 %v1819_v45  ;;  %5821 = vmatmul.mubr.f32.vlgmr.msra.gmra.mxu0 %v1258_v46 }
 0x322   :  { %5831 = vmatpush3.msra.mxu0 %v6495_v27  ;;  %5856 = vmatmul.mubr.f32.vlgmr.msra.gmra.mxu1 %v6534_v17  ;;  %v1769_v27 = vsub.f32 %v1767_v44, %v1768_v48 }
 0x323   :  { %5866 = vmatpush3.xpose.msra.mxu1 %v1819_v45  ;;  %5832 = vmatprep.subr.mxu0 %v6516_v6 }
 0x324   :  { %5834 = vmatprep.mubr.f32.mxu0 %v1245_v31  ;;  %5867 = vmatprep.subr.mxu1 %v1826_v26  ;;  %v1770_v51 = vand.u32 4294901760, %v1769_v27 }
 0x325   :  { %5869 = vmatprep.mubr.f32.mxu1 %v6557_v36  ;;  %5833 = vmatpush3.msra.mxu0 %v6516_v6 }
 0x326   :  { %5844 = vmatprep.subr.mxu0 %v6499_v28  ;;  %5835 = vmatmul.mubr.f32.vlgmr.msra.gmra.mxu0 %v1255_v20 }
 0x327   :  { %5845 = vmatpush3.msra.mxu0 %v6499_v28  ;;  %5868 = vmatpush3.xpose.msra.mxu1 %v1826_v26  ;;  %v1779_v28 = vsub.f32 %v1777_v49, %v1778_v50 }
 0x328   :  { %5846 = vmatprep.subr.mxu0 %v6520_v7  ;;  %5848 = vmatprep.mubr.f32.mxu0 %v1244_v24 }
 0x329   :  { %5879 = vmatprep.subr.mxu1 %v6525_v11  ;;  %5847 = vmatpush3.msra.mxu0 %v6520_v7  ;;  %v1780_v52 = vand.u32 4294901760, %v1779_v28 }
 0x32a   :  { %5858 = vmatprep.subr.mxu0 %v6525_v11  ;;  %5870 = vmatmul.mubr.f32.vlgmr.msra.gmra.mxu1 %v1776_v47 }
 0x32b   :  { %5849 = vmatmul.mubr.f32.vlgmr.msra.gmra.mxu0 %v6534_v17  ;;  %5880 = vmatpush3.xpose.msra.mxu1 %v6525_v11 }
 0x32c   :  { %5859 = vmatpush3.xpose.msra.mxu0 %v6525_v11  ;;  %5883 = vmatprep.mubr.f32.mxu1 %v1768_v48 }
 0x32d   :  { %5860 = vmatprep.subr.mxu0 %v6532_v16  ;;  %5862 = vmatprep.mubr.f32.mxu0 %v1770_v51 }
 0x32e   :  { %5881 = vmatprep.subr.mxu1 %v6532_v16 }
 0x32f   :  { %5882 = vmatpush3.xpose.msra.mxu1 %v6532_v16 }
 0x330   :  { %5861 = vmatpush3.xpose.msra.mxu0 %v6532_v16  ;;  %5893 = vmatprep.subr.mxu1 %v6525_v11 }
 0x331   :  { %5872 = vmatprep.subr.mxu0 %v6537_v18 }
 0x332   :  { %5884 = vmatmul.mubr.f32.vlgmr.msra.gmra.mxu1 %v1778_v50 }
 0x333   :  { %5863 = vmatmul.mubr.f32.vlgmr.msra.gmra.mxu0 %v1780_v52  ;;  %5894 = vmatpush3.xpose.msra.mxu1 %v6525_v11 }
 0x334   :  { %5873 = vmatpush3.xpose.msra.mxu0 %v6537_v18  ;;  %5876 = vmatprep.mubr.f32.mxu0 %v1767_v44 }
 0x335   :  { %5897 = vmatprep.mubr.f32.mxu1 %v6557_v36  ;;  %5874 = vmatprep.subr.mxu0 %v6546_v23 }
 0x336   :  { %5895 = vmatprep.subr.mxu1 %v6532_v16 }
 0x337   :  { %5896 = vmatpush3.xpose.msra.mxu1 %v6532_v16 }
 0x338   :  { %5875 = vmatpush3.xpose.msra.mxu0 %v6546_v23 }
 0x339   :  { %5886 = vmatprep.subr.mxu0 %v6549_v29 }
 0x33a   :  { %5898 = vmatmul.mubr.f32.vlgmr.msra.gmra.mxu1 %v1776_v47 }
 0x33b   :  { %5877 = vmatmul.mubr.f32.vlgmr.msra.gmra.mxu0 %v1777_v49 }
 0x33c   :  { %5887 = vmatpush3.xpose.msra.mxu0 %v6549_v29  ;;  %5890 = vmatprep.mubr.f32.mxu0 %v6557_v36 }
 0x33d   :  { %5888 = vmatprep.subr.mxu0 %v6555_v34 }
 0x340   :  { %5889 = vmatpush3.xpose.msra.mxu0 %v6555_v34 }
 0x343   :  { %5891 = vmatmul.mubr.f32.vlgmr.msra.gmra.mxu0 %v1776_v47 }
 0x3d9   :  { %v5829_v53 = vpop.f32.mrf.mxu1 }
 0x3db   :  { %v1341_v54 = vpop.f32.mrf.mxu1 }
 0x3dd   :  { %v5843_v57 = vpop.f32.mrf.mxu1 }
 0x3df   :  { %v1505_v63 = vpop.f32.mrf.mxu1 }
 0x3e1   :  { %v5822_v55 = vpop.f32.mrf.mxu0 }
 0x3e2   :  { %v1348_v56 = vadd.f32 %v5829_v53, %v5822_v55  ;;  %v5857_v4 = vpop.f32.mrf.mxu1 }
 0x3e3   :  { %v1250_v58 = vpop.f32.mrf.mxu0 }
 0x3e4   :  { %v1342_v59 = vadd.f32 %v1341_v54, %v1250_v58  ;;  %v1669_v11 = vpop.f32.mrf.mxu1 }
 0x3e6   :  { %v5836_v61 = vpop.f32.mrf.mxu0 }
 0x3e7   :  { %v1431_v0 = vadd.f32 %v5836_v61, %v1348_v56 }
 0x3e8   :  { %v1423_v1 = vpop.f32.mrf.mxu0 }
 0x3e9   :  { %v1424_v2 = vadd.f32 %v1423_v1, %v1342_v59  ;;  %v1514_v3 = vadd.f32 %v5843_v57, %v1431_v0 }
 0x3ea   :  { %v5871_v15 = vpop.f32.mrf.mxu1 }
 0x3eb   :  { %v5850_v5 = vpop.f32.mrf.mxu0  ;;  %v1506_v6 = vadd.f32 %v1505_v63, %v1424_v2 }
 0x3ec   :  { %v1597_v7 = vadd.f32 %v5850_v5, %v1514_v3  ;;  %v1863_v20 = vpop.f32.mrf.mxu1 }
 0x3ed   :  { %v1590_v8 = vpop.f32.mrf.mxu0 }
 0x3ee   :  { %v6599_v9 = vadd.f32 %v5857_v4, %v1597_v7  ;;  %v1591_v10 = vadd.f32 %v1590_v8, %v1506_v6 }
 0x3f0   :  { %v6601_v12 = vadd.f32 %v1669_v11, %v1591_v10 }
 0x3f2   :  { %v5885_v23 = vpop.f32.mrf.mxu1 }
 0x3f3   :  { %v5864_v13 = vpop.f32.mrf.mxu0 }
 0x3f4   :  { %v1783_v17 = vadd.f32 %v5864_v13, %v6506_v32  ;;  %v2027_v31 = vpop.f32.mrf.mxu1 }
 0x3f5   :  { %v1772_v16 = vpop.f32.mrf.mxu0 }
 0x3f6   :  { %v1773_v18 = vadd.f32 %v1772_v16, %v6508_v35  ;;  %v1870_v22 = vadd.f32 %v5871_v15, %v1783_v17 }
 0x3f8   :  { %v1864_v29 = vadd.f32 %v1863_v20, %v1773_v18 }
 0x3fa   :  { %v5899_v34 = vpop.f32.mrf.mxu1 }
 0x3fb   :  { %v5878_v21 = vpop.f32.mrf.mxu0 }
 0x3fc   :  { %v1953_v25 = vadd.f32 %v5878_v21, %v1870_v22  ;;  %v2191_v42 = vpop.f32.mrf.mxu1 }
 0x3fd   :  { %v1945_v24 = vpop.f32.mrf.mxu0 }
 0x3fe   :  { %v1946_v30 = vadd.f32 %v1945_v24, %v1864_v29  ;;  %v2036_v33 = vadd.f32 %v5885_v23, %v1953_v25 }
 0x400   :  { %v2028_v38 = vadd.f32 %v2027_v31, %v1946_v30 }
 0x403   :  { %v5892_v36 = vpop.f32.mrf.mxu0 }
 0x404   :  { %v2119_v37 = vadd.f32 %v5892_v36, %v2036_v33 }
 0x405   :  { %v2112_v39 = vpop.f32.mrf.mxu0 }
 0x406   :  { %v2113_v40 = vadd.f32 %v2112_v39, %v2028_v38  ;;  %v2198_v41 = vadd.f32 %v5899_v34, %v2119_v37 }
 0x408   :  { %v2204_v43 = vsel %vm1146_vm2, %v2198_v41, -inf  ;;  %v2192_v44 = vadd.f32 %v2191_v42, %v2113_v40 }
 0x409   :  { %2205 = vmax.xlane.f32.xlu0 %v2204_v43 }
 0x40a   :  { %v2201_v45 = vsel %vm1146_vm2, %v2192_v44, -inf }
 0x40b   :  { %2202 = vmax.xlane.f32.xlu1 %v2201_v45 }
 0x41c   :  { %2219 = vrot.lane.b32.xlu1 %v6472_v62, %s6348_s20 }
 0x41f   :  { %2221 = vrot.lane.b32.xlu0 %v6470_v60, %s6348_s20 }
 0x420   :  { %2743 = vrot.lane.b32.xlu1 %v6470_v60, %s6349_s21 }
 0x423   :  { %2741 = vrot.lane.b32.xlu0 %v6472_v62, %s6349_s21 }
 0x424   :  { %2737 = vrot.lane.b32.xlu1 %v6472_v62, %s6350_s22 }
 0x427   :  { %2739 = vrot.lane.b32.xlu0 %v6470_v60, %s6350_s22 }
 0x492   :  { %v2206_v46 = vpop.xlane.xlu0 %2205 }
 0x493   :  { %v2208_v47 = vsub.f32 %v2198_v41, %v2206_v46 }
 0x494   :  { %v2203_v26 = vpop.xlane.xlu1 %2202 }
 0x495   :  { %v2211_v48 = vmul.f32 1.442695, %v2208_v47  ;;  %v2207_v49 = vsub.f32 %v2192_v44, %v2203_v26 }
 0x496   :  { %v2222_v27 = vpop.permute.xlu0 %2221 }
 0x497   :  { %6200 = vpow2.f32 %v2211_v48  ;;  %v2209_v50 = vmul.f32 1.442695, %v2207_v49  ;;  %v2260_v51 = vand.u32 4294901760, %v2222_v27 }
 0x498   :  { %v2220_v28 = vpop.permute.xlu1 %2219 }
 0x499   :  { %6202 = vpow2.f32 %v2209_v50  ;;  %v6613_v52 = vsub.f32 %v2222_v27, %v2260_v51  ;;  %v2263_v53 = vand.u32 4294901760, %v2220_v28  ;;  %5900 = vmatprep.subr.mxu0 %v2260_v51 }
 0x49a   :  { %5901 = vmatpush3.msra.mxu0 %v2260_v51  ;;  %v2742_v59 = vpop.permute.xlu0 %2741 }
 0x49b   :  { %v6615_v54 = vsub.f32 %v2220_v28, %v2263_v53  ;;  %5902 = vmatprep.subr.mxu0 %v2263_v53  ;;  %v6618_v55 = vand.u32 4294901760, %v6613_v52  ;;  %v2749_v1 = vsel %vm635_vm1, %v2742_v59, 0 }
 0x49c   :  { %5903 = vmatpush3.msra.mxu0 %v2263_v53  ;;  %v2744_v56 = vpop.permute.xlu1 %2743  ;;  %v6634_v5 = vand.u32 4294901760, %v2749_v1 }
 0x49d   :  { %5914 = vmatprep.subr.mxu0 %v6613_v52  ;;  %v2350_v57 = vsub.f32 %v6613_v52, %v6618_v55  ;;  %v6624_v58 = vand.u32 4294901760, %v6615_v54  ;;  %v2751_v61 = vsel %vm635_vm1, %v2744_v56, 0 }
 0x49e   :  { %v6630_v2 = vand.u32 4294901760, %v2751_v61  ;;  %v6646_v15 = vsub.f32 %v2749_v1, %v6634_v5  ;;  %v2740_v25 = vpop.permute.xlu0 %2739 }
 0x49f   :  { %v2351_v63 = vand.u32 4294901760, %v2350_v57  ;;  %v2357_v0 = vsub.f32 %v6615_v54, %v6624_v58  ;;  %v2747_v34 = vsel %vm635_vm1, %v2740_v25, 0 }
 0x4a0   :  { %v6637_v6 = vsub.f32 %v2751_v61, %v6630_v2  ;;  %v2738_v11 = vpop.permute.xlu1 %2737  ;;  %v6653_v24 = vand.u32 4294901760, %v6646_v15  ;;  %v2830_v41 = vand.u32 4294901760, %v2747_v34 }
 0x4a1   :  { %5907 = vmatprep.subr.mxu1 %v2351_v63  ;;  %v2358_v3 = vand.u32 4294901760, %v2357_v0  ;;  %v2745_v20 = vsel %vm635_vm1, %v2738_v11, 0 }
 0x4a2   :  { %5908 = vmatpush3.msra.mxu1 %v2351_v63  ;;  %v6649_v18 = vand.u32 4294901760, %v6637_v6  ;;  %v6655_v29 = vand.u32 4294901760, %v2745_v20  ;;  %v2879_v37 = vsub.f32 %v6646_v15, %v6653_v24  ;;  %v2831_v44 = vsub.f32 %v2747_v34, %v2830_v41 }
 0x4a3   :  { %5909 = vmatprep.subr.mxu1 %v2358_v3 }
 0x4a4   :  { %v6632_v4 = vpop.eup %6200  ;;  %5910 = vmatpush3.msra.mxu1 %v2358_v3  ;;  %v2872_v30 = vsub.f32 %v6637_v6, %v6649_v18  ;;  %v2821_v38 = vsub.f32 %v2745_v20, %v6655_v29  ;;  %v2880_v42 = vand.u32 4294901760, %v2879_v37  ;;  %v2832_v46 = vand.u32 4294901760, %v2831_v44 }
 0x4a5   :  { %5921 = vmatprep.subr.mxu1 %v2260_v51  ;;  %v2229_v7 = vsel %vm1146_vm2, %v6632_v4, 0 }
 0x4a6   :  { %v6641_v8 = vpop.eup %6202  ;;  %v2308_v10 = vand.u32 4294901760, %v2229_v7  ;;  %v2873_v39 = vand.u32 4294901760, %v2872_v30  ;;  %v2822_v43 = vand.u32 4294901760, %v2821_v38  ;;  %v2833_v26 = vsub.f32 %v2831_v44, %v2832_v46 }
 0x4a7   :  { %v2226_v13 = vsel %vm1146_vm2, %v6641_v8, 0 }
 0x4a8   :  { %v2298_v16 = vand.u32 4294901760, %v2226_v13  ;;  %v2309_v17 = vsub.f32 %v2229_v7, %v2308_v10  ;;  %v2823_v45 = vsub.f32 %v2821_v38, %v2822_v43  ;;  %v2834_v48 = vand.u32 4294901760, %v2833_v26 }
 0x4aa   :  { %5911 = vmatprep.mubr.f32.mxu1 %v2298_v16  ;;  %v2299_v21 = vsub.f32 %v2226_v13, %v2298_v16  ;;  %v2310_v22 = vand.u32 4294901760, %v2309_v17  ;;  %v2824_v47 = vand.u32 4294901760, %v2823_v45 }
 0x4ab   :  { %5912 = vmatmul.mubr.f32.vlgmr.msra.gmra.mxu1 %v2308_v10 }
 0x4ac   :  { %5922 = vmatpush3.msra.mxu1 %v2260_v51  ;;  %v2300_v23 = vand.u32 4294901760, %v2299_v21  ;;  %v2311_v31 = vsub.f32 %v2309_v17, %v2310_v22 }
 0x4ad   :  { %5923 = vmatprep.subr.mxu1 %v2263_v53 }
 0x4ae   :  { %5924 = vmatpush3.msra.mxu1 %v2263_v53  ;;  %5925 = vmatprep.mubr.f32.mxu1 %v2300_v23  ;;  %v2301_v33 = vsub.f32 %v2299_v21, %v2300_v23  ;;  %v2312_v40 = vand.u32 4294901760, %v2311_v31 }
 0x4af   :  { %5935 = vmatprep.subr.mxu1 %v2260_v51  ;;  %5926 = vmatmul.mubr.f32.vlgmr.msra.gmra.mxu1 %v2310_v22 }
 0x4b0   :  { %5936 = vmatpush3.msra.mxu1 %v2260_v51  ;;  %5939 = vmatprep.mubr.f32.mxu1 %v2298_v16  ;;  %v2302_v36 = vand.u32 4294901760, %v2301_v33 }
 0x4b1   :  { %5937 = vmatprep.subr.mxu1 %v2263_v53 }
 0x4b2   :  { %5938 = vmatpush3.msra.mxu1 %v2263_v53  ;;  %5904 = vmatprep.mubr.f32.mxu0 %v2302_v36 }
 0x4b3   :  { %5949 = vmatprep.subr.mxu1 %v2873_v39  ;;  %5905 = vmatmul.mubr.f32.vlgmr.msra.gmra.mxu0 %v2312_v40 }
 0x4b4   :  { %5915 = vmatpush3.msra.mxu0 %v6613_v52  ;;  %5940 = vmatmul.mubr.f32.vlgmr.msra.gmra.mxu1 %v2308_v10 }
 0x4b5   :  { %5950 = vmatpush3.xpose.msra.mxu1 %v2873_v39  ;;  %5916 = vmatprep.subr.mxu0 %v6615_v54 }
 0x4b6   :  { %5918 = vmatprep.mubr.f32.mxu0 %v2299_v21  ;;  %5951 = vmatprep.subr.mxu1 %v2880_v42 }
 0x4b7   :  { %5953 = vmatprep.mubr.f32.mxu1 %v6655_v29  ;;  %5917 = vmatpush3.msra.mxu0 %v6615_v54 }
 0x4b8   :  { %5928 = vmatprep.subr.mxu0 %v6618_v55  ;;  %5919 = vmatmul.mubr.f32.vlgmr.msra.gmra.mxu0 %v2309_v17 }
 0x4b9   :  { %5929 = vmatpush3.msra.mxu0 %v6618_v55  ;;  %5952 = vmatpush3.xpose.msra.mxu1 %v2880_v42 }
 0x4ba   :  { %5930 = vmatprep.subr.mxu0 %v6624_v58  ;;  %5932 = vmatprep.mubr.f32.mxu0 %v2298_v16 }
 0x4bb   :  { %5963 = vmatprep.subr.mxu1 %v6630_v2  ;;  %5931 = vmatpush3.msra.mxu0 %v6624_v58 }
 0x4bc   :  { %5942 = vmatprep.subr.mxu0 %v6630_v2  ;;  %5954 = vmatmul.mubr.f32.vlgmr.msra.gmra.mxu1 %v2830_v41 }
 0x4bd   :  { %5933 = vmatmul.mubr.f32.vlgmr.msra.gmra.mxu0 %v2308_v10  ;;  %5964 = vmatpush3.xpose.msra.mxu1 %v6630_v2 }
 0x4be   :  { %5943 = vmatpush3.xpose.msra.mxu0 %v6630_v2  ;;  %5967 = vmatprep.mubr.f32.mxu1 %v2822_v43 }
 0x4bf   :  { %5944 = vmatprep.subr.mxu0 %v6634_v5  ;;  %5946 = vmatprep.mubr.f32.mxu0 %v2824_v47 }
 0x4c0   :  { %5965 = vmatprep.subr.mxu1 %v6634_v5 }
 0x4c1   :  { %5966 = vmatpush3.xpose.msra.mxu1 %v6634_v5 }
 0x4c2   :  { %5945 = vmatpush3.xpose.msra.mxu0 %v6634_v5  ;;  %5977 = vmatprep.subr.mxu1 %v6630_v2 }
 0x4c3   :  { %5956 = vmatprep.subr.mxu0 %v6637_v6 }
 0x4c4   :  { %5968 = vmatmul.mubr.f32.vlgmr.msra.gmra.mxu1 %v2832_v46 }
 0x4c5   :  { %5947 = vmatmul.mubr.f32.vlgmr.msra.gmra.mxu0 %v2834_v48  ;;  %5978 = vmatpush3.xpose.msra.mxu1 %v6630_v2 }
 0x4c6   :  { %5957 = vmatpush3.xpose.msra.mxu0 %v6637_v6  ;;  %5960 = vmatprep.mubr.f32.mxu0 %v2821_v38 }
 0x4c7   :  { %5981 = vmatprep.mubr.f32.mxu1 %v6655_v29  ;;  %5958 = vmatprep.subr.mxu0 %v6646_v15 }
 0x4c8   :  { %5979 = vmatprep.subr.mxu1 %v6634_v5 }
 0x4c9   :  { %5980 = vmatpush3.xpose.msra.mxu1 %v6634_v5 }
 0x4ca   :  { %5959 = vmatpush3.xpose.msra.mxu0 %v6646_v15 }
 0x4cb   :  { %5970 = vmatprep.subr.mxu0 %v6649_v18 }
 0x4cc   :  { %5982 = vmatmul.mubr.f32.vlgmr.msra.gmra.mxu1 %v2830_v41 }
 0x4cd   :  { %5961 = vmatmul.mubr.f32.vlgmr.msra.gmra.mxu0 %v2831_v44 }
 0x4ce   :  { %5971 = vmatpush3.xpose.msra.mxu0 %v6649_v18  ;;  %5974 = vmatprep.mubr.f32.mxu0 %v6655_v29 }
 0x4cf   :  { %5972 = vmatprep.subr.mxu0 %v6653_v24 }
 0x4d2   :  { %5973 = vmatpush3.xpose.msra.mxu0 %v6653_v24 }
 0x4d5   :  { %5975 = vmatmul.mubr.f32.vlgmr.msra.gmra.mxu0 %v2830_v41 }
 0x56b   :  { %v5913_v49 = vpop.f32.mrf.mxu1 }
 0x56d   :  { %v2395_v27 = vpop.f32.mrf.mxu1 }
 0x56f   :  { %v5927_v28 = vpop.f32.mrf.mxu1 }
 0x571   :  { %v2559_v55 = vpop.f32.mrf.mxu1 }
 0x573   :  { %v5906_v50 = vpop.f32.mrf.mxu0 }
 0x574   :  { %v2402_v51 = vadd.f32 %v5913_v49, %v5906_v50  ;;  %v5941_v61 = vpop.f32.mrf.mxu1 }
 0x575   :  { %v2304_v52 = vpop.f32.mrf.mxu0 }
 0x576   :  { %v2396_v53 = vadd.f32 %v2395_v27, %v2304_v52  ;;  %v2723_v6 = vpop.f32.mrf.mxu1 }
 0x578   :  { %v5920_v54 = vpop.f32.mrf.mxu0 }
 0x579   :  { %v2485_v56 = vadd.f32 %v5920_v54, %v2402_v51 }
 0x57a   :  { %v2477_v57 = vpop.f32.mrf.mxu0 }
 0x57b   :  { %v2478_v58 = vadd.f32 %v2477_v57, %v2396_v53  ;;  %v2568_v59 = vadd.f32 %v5927_v28, %v2485_v56 }
 0x57c   :  { %v5955_v11 = vpop.f32.mrf.mxu1 }
 0x57d   :  { %v5934_v63 = vpop.f32.mrf.mxu0  ;;  %v2560_v0 = vadd.f32 %v2559_v55, %v2478_v58 }
 0x57e   :  { %v2651_v1 = vadd.f32 %v5934_v63, %v2568_v59  ;;  %v2917_v17 = vpop.f32.mrf.mxu1 }
 0x57f   :  { %v2644_v2 = vpop.f32.mrf.mxu0 }
 0x580   :  { %v6693_v3 = vadd.f32 %v5941_v61, %v2651_v1  ;;  %v2645_v5 = vadd.f32 %v2644_v2, %v2560_v0 }
 0x582   :  { %v6695_v7 = vadd.f32 %v2723_v6, %v2645_v5 }
 0x584   :  { %v5969_v21 = vpop.f32.mrf.mxu1 }
 0x585   :  { %v5948_v10 = vpop.f32.mrf.mxu0 }
 0x586   :  { %v2837_v15 = vadd.f32 %v5948_v10, %v6506_v32  ;;  %v3081_v29 = vpop.f32.mrf.mxu1 }
 0x587   :  { %v2826_v13 = vpop.f32.mrf.mxu0 }
 0x588   :  { %v2827_v16 = vadd.f32 %v2826_v13, %v6508_v35  ;;  %v2924_v20 = vadd.f32 %v5955_v11, %v2837_v15 }
 0x58a   :  { %v2918_v24 = vadd.f32 %v2917_v17, %v2827_v16 }
 0x58c   :  { %v5983_v31 = vpop.f32.mrf.mxu1 }
 0x58d   :  { %v5962_v18 = vpop.f32.mrf.mxu0 }
 0x58e   :  { %v3007_v23 = vadd.f32 %v5962_v18, %v2924_v20  ;;  %v3245_v32 = vpop.f32.mrf.mxu1 }
 0x58f   :  { %v2999_v22 = vpop.f32.mrf.mxu0 }
 0x590   :  { %v3000_v25 = vadd.f32 %v2999_v22, %v2918_v24  ;;  %v3090_v30 = vadd.f32 %v5969_v21, %v3007_v23 }
 0x592   :  { %v3082_v36 = vadd.f32 %v3081_v29, %v3000_v25 }
 0x595   :  { %v5976_v33 = vpop.f32.mrf.mxu0 }
 0x596   :  { %v3173_v34 = vadd.f32 %v5976_v33, %v3090_v30 }
 0x597   :  { %v3166_v37 = vpop.f32.mrf.mxu0 }
 0x598   :  { %v3167_v38 = vadd.f32 %v3166_v37, %v3082_v36  ;;  %v3252_v39 = vadd.f32 %v5983_v31, %v3173_v34 }
 0x59a   :  { %v3258_v35 = vsel %vm1146_vm2, %v3252_v39, -inf  ;;  %v3246_v40 = vadd.f32 %v3245_v32, %v3167_v38 }
 0x59b   :  { %3259 = vmax.xlane.f32.xlu0 %v3258_v35 }
 0x59c   :  { %v3255_v41 = vsel %vm1146_vm2, %v3246_v40, -inf }
 0x59d   :  { %3256 = vmax.xlane.f32.xlu1 %v3255_v41 }
 0x5ae   :  { %3273 = vrot.lane.b32.xlu1 %v6472_v62, %s6351_s23 }
 0x5b1   :  { %3275 = vrot.lane.b32.xlu0 %v6470_v60, %s6351_s23 }
 0x5b2   :  { %3797 = vrot.lane.b32.xlu1 %v6470_v60, %s6352_s24 }
 0x5b5   :  { %3795 = vrot.lane.b32.xlu0 %v6472_v62, %s6352_s24 }
 0x5b6   :  { %3791 = vrot.lane.b32.xlu1 %v6472_v62, %s6353_s25 }
 0x5b9   :  { %3793 = vrot.lane.b32.xlu0 %v6470_v60, %s6353_s25 }
 0x624   :  { %v3260_v42 = vpop.xlane.xlu0 %3259 }
 0x625   :  { %v3262_v43 = vsub.f32 %v3252_v39, %v3260_v42 }
 0x626   :  { %v3257_v44 = vpop.xlane.xlu1 %3256 }
 0x627   :  { %v3265_v45 = vmul.f32 1.442695, %v3262_v43  ;;  %v3261_v46 = vsub.f32 %v3246_v40, %v3257_v44 }
 0x628   :  { %v3276_v47 = vpop.permute.xlu0 %3275 }
 0x629   :  { %6204 = vpow2.f32 %v3265_v45  ;;  %v3263_v26 = vmul.f32 1.442695, %v3261_v46  ;;  %v3314_v48 = vand.u32 4294901760, %v3276_v47 }
 0x62a   :  { %v3274_v49 = vpop.permute.xlu1 %3273 }
 0x62b   :  { %6206 = vpow2.f32 %v3263_v26  ;;  %v6707_v27 = vsub.f32 %v3276_v47, %v3314_v48  ;;  %v3317_v50 = vand.u32 4294901760, %v3274_v49  ;;  %5984 = vmatprep.subr.mxu0 %v3314_v48 }
 0x62c   :  { %5985 = vmatpush3.msra.mxu0 %v3314_v48  ;;  %v3796_v55 = vpop.permute.xlu0 %3795 }
 0x62d   :  { %v6709_v51 = vsub.f32 %v3274_v49, %v3317_v50  ;;  %5986 = vmatprep.subr.mxu0 %v3317_v50  ;;  %v6712_v28 = vand.u32 4294901760, %v6707_v27  ;;  %v3803_v59 = vsel %vm635_vm1, %v3796_v55, 0 }
 0x62e   :  { %5987 = vmatpush3.msra.mxu0 %v3317_v50  ;;  %v3798_v52 = vpop.permute.xlu1 %3797  ;;  %v6728_v1 = vand.u32 4294901760, %v3803_v59 }
 0x62f   :  { %5998 = vmatprep.subr.mxu0 %v6707_v27  ;;  %v3404_v53 = vsub.f32 %v6707_v27, %v6712_v28  ;;  %v6718_v54 = vand.u32 4294901760, %v6709_v51  ;;  %v3805_v56 = vsel %vm635_vm1, %v3798_v52, 0 }
 0x630   :  { %v6724_v61 = vand.u32 4294901760, %v3805_v56  ;;  %v6740_v15 = vsub.f32 %v3803_v59, %v6728_v1  ;;  %v3794_v25 = vpop.permute.xlu0 %3793 }
 0x631   :  { %v3405_v57 = vand.u32 4294901760, %v3404_v53  ;;  %v3411_v58 = vsub.f32 %v6709_v51, %v6718_v54  ;;  %v3801_v34 = vsel %vm635_vm1, %v3794_v25, 0 }
 0x632   :  { %v6731_v2 = vsub.f32 %v3805_v56, %v6724_v61  ;;  %v3792_v11 = vpop.permute.xlu1 %3791  ;;  %v6747_v24 = vand.u32 4294901760, %v6740_v15  ;;  %v3884_v35 = vand.u32 4294901760, %v3801_v34 }
 0x633   :  { %5991 = vmatprep.subr.mxu1 %v3405_v57  ;;  %v3412_v63 = vand.u32 4294901760, %v3411_v58  ;;  %v3799_v20 = vsel %vm635_vm1, %v3792_v11, 0 }
 0x634   :  { %5992 = vmatpush3.msra.mxu1 %v3405_v57  ;;  %v6743_v18 = vand.u32 4294901760, %v6731_v2  ;;  %v6749_v29 = vand.u32 4294901760, %v3799_v20  ;;  %v3933_v37 = vsub.f32 %v6740_v15, %v6747_v24  ;;  %v3885_v42 = vsub.f32 %v3801_v34, %v3884_v35 }
 0x635   :  { %5993 = vmatprep.subr.mxu1 %v3412_v63 }
 0x636   :  { %v6726_v0 = vpop.eup %6204  ;;  %5994 = vmatpush3.msra.mxu1 %v3412_v63  ;;  %v3926_v30 = vsub.f32 %v6731_v2, %v6743_v18  ;;  %v3875_v38 = vsub.f32 %v3799_v20, %v6749_v29  ;;  %v3934_v40 = vand.u32 4294901760, %v3933_v37  ;;  %v3886_v44 = vand.u32 4294901760, %v3885_v42  ;;  %v6229_v20 = vld [vmem:[#allocation8] sm:$0xff] }
 0x637   :  { %6005 = vmatprep.subr.mxu1 %v3314_v48  ;;  %v3283_v5 = vsel %vm1146_vm2, %v6726_v0, 0 }
 0x638   :  { %v6735_v6 = vpop.eup %6206  ;;  %v3362_v10 = vand.u32 4294901760, %v3283_v5  ;;  %v3927_v39 = vand.u32 4294901760, %v3926_v30  ;;  %v3876_v41 = vand.u32 4294901760, %v3875_v38  ;;  %v3887_v46 = vsub.f32 %v3885_v42, %v3886_v44 }
 0x639   :  { %v3280_v13 = vsel %vm1146_vm2, %v6735_v6, 0 }
 0x63a   :  { %v3352_v16 = vand.u32 4294901760, %v3280_v13  ;;  %v3363_v17 = vsub.f32 %v3283_v5, %v3362_v10  ;;  %v3877_v43 = vsub.f32 %v3875_v38, %v3876_v41  ;;  %v3888_v47 = vand.u32 4294901760, %v3887_v46 }
 0x63b   :  { %v2216_v46 = vsel %vm1146_vm2, %v6632_v4, 0.0 }
 0x63c   :  { %5995 = vmatprep.mubr.f32.mxu1 %v3352_v16  ;;  %v3353_v21 = vsub.f32 %v3280_v13, %v3352_v16  ;;  %v3364_v22 = vand.u32 4294901760, %v3363_v17  ;;  %v3878_v45 = vand.u32 4294901760, %v3877_v43 }
 0x63d   :  { %5996 = vmatmul.mubr.f32.vlgmr.msra.gmra.mxu1 %v3362_v10 }
 0x63e   :  { %6006 = vmatpush3.msra.mxu1 %v3314_v48  ;;  %v3354_v23 = vand.u32 4294901760, %v3353_v21  ;;  %v3365_v31 = vsub.f32 %v3363_v17, %v3364_v22 }
 0x63f   :  { %6007 = vmatprep.subr.mxu1 %v3317_v50 }
 0x640   :  { %6008 = vmatpush3.msra.mxu1 %v3317_v50  ;;  %6009 = vmatprep.mubr.f32.mxu1 %v3354_v23  ;;  %v3355_v33 = vsub.f32 %v3353_v21, %v3354_v23  ;;  %v3366_v32 = vand.u32 4294901760, %v3365_v31 }
 0x641   :  { %6019 = vmatprep.subr.mxu1 %v3314_v48  ;;  %6010 = vmatmul.mubr.f32.vlgmr.msra.gmra.mxu1 %v3364_v22 }
 0x642   :  { %6020 = vmatpush3.msra.mxu1 %v3314_v48  ;;  %6023 = vmatprep.mubr.f32.mxu1 %v3352_v16  ;;  %v3356_v36 = vand.u32 4294901760, %v3355_v33 }
 0x643   :  { %6021 = vmatprep.subr.mxu1 %v3317_v50 }
 0x644   :  { %6022 = vmatpush3.msra.mxu1 %v3317_v50  ;;  %5988 = vmatprep.mubr.f32.mxu0 %v3356_v36 }
 0x645   :  { %6033 = vmatprep.subr.mxu1 %v3927_v39  ;;  %5989 = vmatmul.mubr.f32.vlgmr.msra.gmra.mxu0 %v3366_v32 }
 0x646   :  { %5999 = vmatpush3.msra.mxu0 %v6707_v27  ;;  %6024 = vmatmul.mubr.f32.vlgmr.msra.gmra.mxu1 %v3362_v10 }
 0x647   :  { %6034 = vmatpush3.xpose.msra.mxu1 %v3927_v39  ;;  %6000 = vmatprep.subr.mxu0 %v6709_v51 }
 0x648   :  { %6002 = vmatprep.mubr.f32.mxu0 %v3353_v21  ;;  %6035 = vmatprep.subr.mxu1 %v3934_v40 }
 0x649   :  { %6037 = vmatprep.mubr.f32.mxu1 %v6749_v29  ;;  %6001 = vmatpush3.msra.mxu0 %v6709_v51 }
 0x64a   :  { %6012 = vmatprep.subr.mxu0 %v6712_v28  ;;  %6003 = vmatmul.mubr.f32.vlgmr.msra.gmra.mxu0 %v3363_v17  ;;  %v6228_v17 = vld [vmem:[#allocation8 + $0x8] sm:$0xff] }
 0x64b   :  { %6013 = vmatpush3.msra.mxu0 %v6712_v28  ;;  %6036 = vmatpush3.xpose.msra.mxu1 %v3934_v40 }
 0x64c   :  { %6014 = vmatprep.subr.mxu0 %v6718_v54  ;;  %6016 = vmatprep.mubr.f32.mxu0 %v3352_v16 }
 0x64d   :  { %6047 = vmatprep.subr.mxu1 %v6724_v61  ;;  %6015 = vmatpush3.msra.mxu0 %v6718_v54 }
 0x64e   :  { %6026 = vmatprep.subr.mxu0 %v6724_v61  ;;  %6038 = vmatmul.mubr.f32.vlgmr.msra.gmra.mxu1 %v3884_v35 }
 0x64f   :  { %6017 = vmatmul.mubr.f32.vlgmr.msra.gmra.mxu0 %v3362_v10  ;;  %6048 = vmatpush3.xpose.msra.mxu1 %v6724_v61 }
 0x650   :  { %6027 = vmatpush3.xpose.msra.mxu0 %v6724_v61  ;;  %6051 = vmatprep.mubr.f32.mxu1 %v3876_v41 }
 0x651   :  { %6028 = vmatprep.subr.mxu0 %v6728_v1  ;;  %6030 = vmatprep.mubr.f32.mxu0 %v3878_v45 }
 0x652   :  { %6049 = vmatprep.subr.mxu1 %v6728_v1 }
 0x653   :  { %6050 = vmatpush3.xpose.msra.mxu1 %v6728_v1 }
 0x654   :  { %6029 = vmatpush3.xpose.msra.mxu0 %v6728_v1  ;;  %6061 = vmatprep.subr.mxu1 %v6724_v61 }
 0x655   :  { %6040 = vmatprep.subr.mxu0 %v6731_v2 }
 0x656   :  { %6052 = vmatmul.mubr.f32.vlgmr.msra.gmra.mxu1 %v3886_v44 }
 0x657   :  { %6031 = vmatmul.mubr.f32.vlgmr.msra.gmra.mxu0 %v3888_v47  ;;  %6062 = vmatpush3.xpose.msra.mxu1 %v6724_v61  ;;  %v2213_v47 = vsel %vm1146_vm2, %v6641_v8, 0.0 }
 0x658   :  { %6041 = vmatpush3.xpose.msra.mxu0 %v6731_v2  ;;  %6044 = vmatprep.mubr.f32.mxu0 %v3875_v38 }
 0x659   :  { %6065 = vmatprep.mubr.f32.mxu1 %v6749_v29  ;;  %6042 = vmatprep.subr.mxu0 %v6740_v15 }
 0x65a   :  { %6063 = vmatprep.subr.mxu1 %v6728_v1 }
 0x65b   :  { %6064 = vmatpush3.xpose.msra.mxu1 %v6728_v1 }
 0x65c   :  { %6043 = vmatpush3.xpose.msra.mxu0 %v6740_v15 }
 0x65d   :  { %6054 = vmatprep.subr.mxu0 %v6743_v18 }
 0x65e   :  { %6066 = vmatmul.mubr.f32.vlgmr.msra.gmra.mxu1 %v3884_v35 }
 0x65f   :  { %6045 = vmatmul.mubr.f32.vlgmr.msra.gmra.mxu0 %v3885_v42 }
 0x660   :  { %6055 = vmatpush3.xpose.msra.mxu0 %v6743_v18  ;;  %6058 = vmatprep.mubr.f32.mxu0 %v6749_v29 }
 0x661   :  { %6056 = vmatprep.subr.mxu0 %v6747_v24 }
 0x664   :  { %6057 = vmatpush3.xpose.msra.mxu0 %v6747_v24 }
 0x667   :  { %6059 = vmatmul.mubr.f32.vlgmr.msra.gmra.mxu0 %v3884_v35 }
 0x6fd   :  { %v5997_v26 = vpop.f32.mrf.mxu1 }
 0x6ff   :  { %v3449_v48 = vpop.f32.mrf.mxu1 }
 0x701   :  { %v6011_v50 = vpop.f32.mrf.mxu1 }
 0x703   :  { %v3613_v53 = vpop.f32.mrf.mxu1 }
 0x705   :  { %v5990_v49 = vpop.f32.mrf.mxu0 }
 0x706   :  { %v3456_v27 = vadd.f32 %v5997_v26, %v5990_v49  ;;  %v6025_v58 = vpop.f32.mrf.mxu1  ;;  %v3267_v26 = vsel %vm1146_vm2, %v6735_v6, 0.0 }
 0x707   :  { %v3358_v51 = vpop.f32.mrf.mxu0 }
 0x708   :  { %v3450_v28 = vadd.f32 %v3449_v48, %v3358_v51  ;;  %v3777_v10 = vpop.f32.mrf.mxu1  ;;  %v3270_v48 = vsel %vm1146_vm2, %v6726_v0, 0.0 }
 0x70a   :  { %v6004_v52 = vpop.f32.mrf.mxu0 }
 0x70b   :  { %v3539_v54 = vadd.f32 %v6004_v52, %v3456_v27 }
 0x70c   :  { %v3531_v55 = vpop.f32.mrf.mxu0 }
 0x70d   :  { %v3532_v56 = vadd.f32 %v3531_v55, %v3450_v28  ;;  %v3622_v57 = vadd.f32 %v6011_v50, %v3539_v54 }
 0x70e   :  { %v6039_v15 = vpop.f32.mrf.mxu1 }
 0x70f   :  { %v6018_v59 = vpop.f32.mrf.mxu0  ;;  %v3614_v61 = vadd.f32 %v3613_v53, %v3532_v56 }
 0x710   :  { %v3705_v63 = vadd.f32 %v6018_v59, %v3622_v57  ;;  %v3971_v22 = vpop.f32.mrf.mxu1 }
 0x711   :  { %v3698_v1 = vpop.f32.mrf.mxu0 }
 0x712   :  { %v6787_v2 = vadd.f32 %v6025_v58, %v3705_v63  ;;  %v3699_v5 = vadd.f32 %v3698_v1, %v3614_v61 }
 0x714   :  { %v6789_v11 = vadd.f32 %v3777_v10, %v3699_v5 }
 0x716   :  { %v6053_v25 = vpop.f32.mrf.mxu1 }
 0x717   :  { %v6032_v13 = vpop.f32.mrf.mxu0 }
 0x718   :  { %v3891_v18 = vadd.f32 %v6228_v17, %v6032_v13  ;;  %v4135_v34 = vpop.f32.mrf.mxu1  ;;  %v1162_v17 = vsel %vm1146_vm2, %v6528_v14, 0.0 }
 0x719   :  { %v3880_v16 = vpop.f32.mrf.mxu0 }
 0x71a   :  { %v3881_v21 = vadd.f32 %v6229_v20, %v3880_v16  ;;  %v3978_v24 = vadd.f32 %v6039_v15, %v3891_v18 }
 0x71c   :  { %v3972_v31 = vadd.f32 %v3971_v22, %v3881_v21  ;;  %v1159_v21 = vsel %vm1146_vm2, %v6540_v19, 0.0 }
 0x71e   :  { %v6067_v37 = vpop.f32.mrf.mxu1 }
 0x71f   :  { %v6046_v23 = vpop.f32.mrf.mxu0 }
 0x720   :  { %v4061_v30 = vadd.f32 %v6046_v23, %v3978_v24  ;;  %v4299_v42 = vpop.f32.mrf.mxu1 }
 0x721   :  { %v4053_v29 = vpop.f32.mrf.mxu0 }
 0x722   :  { %v4054_v33 = vadd.f32 %v4053_v29, %v3972_v31  ;;  %v4144_v36 = vadd.f32 %v6053_v25, %v4061_v30 }
 0x724   :  { %v4136_v32 = vadd.f32 %v4135_v34, %v4054_v33 }
 0x727   :  { %v6060_v38 = vpop.f32.mrf.mxu0 }
 0x728   :  { %v4227_v39 = vadd.f32 %v6060_v38, %v4144_v36 }
 0x729   :  { %v4220_v35 = vpop.f32.mrf.mxu0 }
 0x72a   :  { %v4221_v40 = vadd.f32 %v4220_v35, %v4136_v32  ;;  %v4306_v41 = vadd.f32 %v6067_v37, %v4227_v39 }
 0x72c   :  { %v4312_v43 = vsel %vm1146_vm2, %v4306_v41, -inf  ;;  %v4300_v44 = vadd.f32 %v4299_v42, %v4221_v40  ;;  %v4879_v40 = vld [vmem:[#allocation7 + $0x18] sm:$0xff] }
 0x72d   :  { %4313 = vmax.xlane.f32.xlu0 %v4312_v43  ;;  %v4878_v43 = vld [vmem:[#allocation7 + $0x10] sm:$0xff] }
 0x72e   :  { %v4309_v45 = vsel %vm1146_vm2, %v4300_v44, -inf }
 0x72f   :  { %4310 = vmax.xlane.f32.xlu1 %v4309_v45  ;;  %v4877_v45 = vld [vmem:[#allocation7 + $0x8] sm:$0xff] }
 0x740   :  { %4327 = vrot.lane.b32.xlu1 %v6472_v62, %s6354_s28 }
 0x743   :  { %4329 = vrot.lane.b32.xlu0 %v6470_v60, %s6354_s28 }
 0x762   :  { %2217 = vadd.xlane.f32.xlu0 %v2216_v46 }
 0x764   :  { %2214 = vadd.xlane.f32.xlu1 %v2213_v47  ;;  %v6834_v47 = vand.u32 4294901760, %v4877_v45 }
 0x766   :  { %3268 = vadd.xlane.f32.xlu0 %v3267_v26 }
 0x768   :  { %3271 = vadd.xlane.f32.xlu1 %v3270_v48 }
 0x7b6   :  { %v4314_v49 = vpop.xlane.xlu0 %4313 }
 0x7b7   :  { %v4316_v62 = vsub.f32 %v4306_v41, %v4314_v49  ;;  %v6817_v41 = vand.u32 4294901760, %v4879_v40  ;;  %v4876_v49 = vld [vmem:[#allocation7] sm:$0xff] }
 0x7b8   :  { %v4311_v27 = vpop.xlane.xlu1 %4310 }
 0x7b9   :  { %v4319_v60 = vmul.f32 1.442695, %v4316_v62  ;;  %v4315_v50 = vsub.f32 %v4300_v44, %v4311_v27  ;;  %v6829_v44 = vand.u32 4294901760, %v4878_v43  ;;  %v6842_v27 = vsub.f32 %v4877_v45, %v6834_v47 }
 0x7ba   :  { %v4330_v51 = vpop.permute.xlu0 %4329 }
 0x7bb   :  { %6208 = vpow2.f32 %v4319_v60  ;;  %v4317_v4 = vmul.f32 1.442695, %v4315_v50  ;;  %v4368_v28 = vand.u32 4294901760, %v4330_v51  ;;  %v6832_v46 = vsub.f32 %v4878_v43, %v6829_v44 }
 0x7bc   :  { %v4328_v52 = vpop.permute.xlu1 %4327  ;;  %v6844_v60 = vand.u32 4294901760, %v4876_v49 }
 0x7bd   :  { %6210 = vpow2.f32 %v4317_v4  ;;  %v4456_v8 = vsub.f32 %v4330_v51, %v4368_v28  ;;  %v4371_v53 = vand.u32 4294901760, %v4328_v52  ;;  %6068 = vmatprep.subr.mxu0 %v4368_v28  ;;  %v6839_v62 = vand.u32 4294901760, %v6832_v46 }
 0x7be   :  { %6069 = vmatpush3.msra.mxu0 %v4368_v28  ;;  %v6851_v4 = vand.u32 4294901760, %v6842_v27 }
 0x7bf   :  { %v4463_v6 = vsub.f32 %v4328_v52, %v4371_v53  ;;  %6070 = vmatprep.subr.mxu0 %v4371_v53  ;;  %v4457_v54 = vand.u32 4294901760, %v4456_v8  ;;  %v5017_v51 = vsub.f32 %v6832_v46, %v6839_v62 }
 0x7c0   :  { %6071 = vmatpush3.msra.mxu0 %v4371_v53 }
 0x7c1   :  { %6082 = vmatprep.subr.mxu0 %v4456_v8  ;;  %v4458_v0 = vsub.f32 %v4456_v8, %v4457_v54  ;;  %v4464_v55 = vand.u32 4294901760, %v4463_v6 }
 0x7c3   :  { %v4459_v56 = vand.u32 4294901760, %v4458_v0  ;;  %v4465_v57 = vsub.f32 %v4463_v6, %v4464_v55 }
 0x7c5   :  { %6075 = vmatprep.subr.mxu1 %v4459_v56  ;;  %v4466_v58 = vand.u32 4294901760, %v4465_v57 }
 0x7c6   :  { %6076 = vmatpush3.msra.mxu1 %v4459_v56 }
 0x7c7   :  { %6077 = vmatprep.subr.mxu1 %v4466_v58 }
 0x7c8   :  { %v6209_v59 = vpop.eup %6208  ;;  %6078 = vmatpush3.msra.mxu1 %v4466_v58 }
 0x7c9   :  { %6089 = vmatprep.subr.mxu1 %v4368_v28  ;;  %v4324_v61 = vsel %vm1146_vm2, %v6209_v59, 0.0  ;;  %v4337_v63 = vsel %vm1146_vm2, %v6209_v59, 0 }
 0x7ca   :  { %v6211_v1 = vpop.eup %6210  ;;  %4325 = vadd.xlane.f32.xlu1 %v4324_v61  ;;  %v4416_v5 = vand.u32 4294901760, %v4337_v63 }
 0x7cb   :  { %v4321_v10 = vsel %vm1146_vm2, %v6211_v1, 0.0  ;;  %v4334_v13 = vsel %vm1146_vm2, %v6211_v1, 0 }
 0x7cc   :  { %4322 = vadd.xlane.f32.xlu0 %v4321_v10  ;;  %v4406_v15 = vand.u32 4294901760, %v4334_v13  ;;  %v4417_v16 = vsub.f32 %v4337_v63, %v4416_v5 }
 0x7ce   :  { %1163 = vadd.xlane.f32.xlu1 %v1162_v17  ;;  %6079 = vmatprep.mubr.f32.mxu1 %v4406_v15  ;;  %v4407_v18 = vsub.f32 %v4334_v13, %v4406_v15  ;;  %v4418_v20 = vand.u32 4294901760, %v4417_v16 }
 0x7cf   :  { %6080 = vmatmul.mubr.f32.vlgmr.msra.gmra.mxu1 %v4416_v5 }
 0x7d0   :  { %6090 = vmatpush3.msra.mxu1 %v4368_v28  ;;  %1160 = vadd.xlane.f32.xlu0 %v1159_v21  ;;  %v4408_v22 = vand.u32 4294901760, %v4407_v18  ;;  %v4419_v23 = vsub.f32 %v4417_v16, %v4418_v20 }
 0x7d1   :  { %6091 = vmatprep.subr.mxu1 %v4371_v53 }
 0x7d2   :  { %6092 = vmatpush3.msra.mxu1 %v4371_v53  ;;  %6093 = vmatprep.mubr.f32.mxu1 %v4408_v22  ;;  %v4409_v24 = vsub.f32 %v4407_v18, %v4408_v22  ;;  %v4420_v25 = vand.u32 4294901760, %v4419_v23 }
 0x7d3   :  { %6103 = vmatprep.subr.mxu1 %v4368_v28  ;;  %6094 = vmatmul.mubr.f32.vlgmr.msra.gmra.mxu1 %v4418_v20 }
 0x7d4   :  { %6104 = vmatpush3.msra.mxu1 %v4368_v28  ;;  %6107 = vmatprep.mubr.f32.mxu1 %v4406_v15  ;;  %v4410_v14 = vand.u32 4294901760, %v4409_v24  ;;  %v6854_v28 = vsub.f32 %v4876_v49, %v6844_v60 }
 0x7d5   :  { %6105 = vmatprep.subr.mxu1 %v4371_v53 }
 0x7d6   :  { %6106 = vmatpush3.msra.mxu1 %v4371_v53  ;;  %6072 = vmatprep.mubr.f32.mxu0 %v4410_v14  ;;  %v5018_v53 = vand.u32 4294901760, %v5017_v51 }
 0x7d7   :  { %6073 = vmatmul.mubr.f32.vlgmr.msra.gmra.mxu0 %v4420_v25  ;;  %6108 = vmatmul.mubr.f32.vlgmr.msra.gmra.mxu1 %v4416_v5 }
 0x7d8   :  { %6083 = vmatpush3.msra.mxu0 %v4456_v8  ;;  %6086 = vmatprep.mubr.f32.mxu0 %v4407_v18 }
 0x7d9   :  { %6084 = vmatprep.subr.mxu0 %v4463_v6 }
 0x7da   :  { %6085 = vmatpush3.msra.mxu0 %v4463_v6  ;;  %v5024_v6 = vsub.f32 %v6842_v27, %v6851_v4 }
 0x7db   :  { %6096 = vmatprep.subr.mxu0 %v4457_v54  ;;  %6087 = vmatmul.mubr.f32.vlgmr.msra.gmra.mxu0 %v4417_v16 }
 0x7dc   :  { %6097 = vmatpush3.msra.mxu0 %v4457_v54  ;;  %6100 = vmatprep.mubr.f32.mxu0 %v4406_v15  ;;  %v6861_v54 = vand.u32 4294901760, %v6854_v28  ;;  %v5025_v56 = vand.u32 4294901760, %v5024_v6 }
 0x7dd   :  { %6098 = vmatprep.subr.mxu0 %v4464_v55 }
 0x7de   :  { %6099 = vmatpush3.msra.mxu0 %v4464_v55  ;;  %v5031_v57 = vsub.f32 %v6854_v28, %v6861_v54 }
 0x7df   :  { %6101 = vmatmul.mubr.f32.vlgmr.msra.gmra.mxu0 %v4416_v5  ;;  %6110 = vmatprep.subr.mxu0 %v6817_v41 }
 0x7e0   :  { %6111 = vmatpush3.msra.mxu0 %v6817_v41  ;;  %v5032_v1 = vand.u32 4294901760, %v5031_v57 }
 0x7e1   :  { %6112 = vmatprep.subr.mxu0 %v6829_v44 }
 0x7e2   :  { %6113 = vmatpush3.msra.mxu0 %v6829_v44 }
 0x7e3   :  { %6114 = vmatprep.subr.mxu0 %v6834_v47 }
 0x7e4   :  { %6115 = vmatpush3.msra.mxu0 %v6834_v47 }
 0x7e5   :  { %6116 = vmatprep.subr.mxu0 %v6844_v60 }
 0x7e6   :  { %6117 = vmatpush3.msra.mxu0 %v6844_v60 }
 0x7eb   :  { %v2218_v19 = vpop.xlane.xlu0 %2217 }
 0x7ec   :  { %6212 = vrcp.f32 %v2218_v19 }
 0x7ed   :  { %v2215_v29 = vpop.xlane.xlu1 %2214 }
 0x7ee   :  { %6214 = vrcp.f32 %v2215_v29 }
 0x7ef   :  { %v3269_v30 = vpop.xlane.xlu0 %3268 }
 0x7f0   :  { %6216 = vrcp.f32 %v3269_v30 }
 0x7f1   :  { %v3272_v31 = vpop.xlane.xlu1 %3271 }
 0x7f2   :  { %6218 = vrcp.f32 %v3272_v31 }
 0x7f9   :  { %v6213_v33 = vpop.eup %6212 }
 0x7fa   :  { %v2736_v34 = vmul.f32 %v6213_v33, %v6693_v3  ;;  %v6820_v3 = vsub.f32 %v4879_v40, %v6817_v41 }
 0x7fb   :  { %v6215_v36 = vpop.eup %6214 }
 0x7fc   :  { %4849 = vrot.lane.b32.xlu1 %v2736_v34, %s6341_s27  ;;  %v2734_v37 = vmul.f32 %v6215_v36, %v6695_v7  ;;  %v6825_v7 = vand.u32 4294901760, %v6820_v3  ;;  %6132 = vmatprep.subr.mxu0 %v6820_v3 }
 0x7fd   :  { %v6217_v38 = vpop.eup %6216 }
 0x7fe   :  { %4847 = vrot.lane.b32.xlu0 %v2734_v37, %s6341_s27  ;;  %v3788_v39 = vmul.f32 %v6217_v38, %v6789_v11  ;;  %v5010_v11 = vsub.f32 %v6820_v3, %v6825_v7 }
 0x7ff   :  { %v6219_v32 = vpop.eup %6218 }
 0x800   :  { %4855 = vrot.lane.b32.xlu1 %v3788_v39, %s6355_s29  ;;  %v3790_v35 = vmul.f32 %v6219_v32, %v6787_v2  ;;  %v5011_v42 = vand.u32 4294901760, %v5010_v11 }
 0x802   :  { %4857 = vrot.lane.b32.xlu0 %v3790_v35, %s6355_s29  ;;  %6121 = vmatprep.subr.mxu1 %v5011_v42 }
 0x803   :  { %6122 = vmatpush3.msra.mxu1 %v5011_v42 }
 0x804   :  { %6123 = vmatprep.subr.mxu1 %v5018_v53 }
 0x805   :  { %6124 = vmatpush3.msra.mxu1 %v5018_v53 }
 0x806   :  { %6125 = vmatprep.subr.mxu1 %v5025_v56 }
 0x807   :  { %6126 = vmatpush3.msra.mxu1 %v5025_v56 }
 0x808   :  { %6127 = vmatprep.subr.mxu1 %v5032_v1 }
 0x809   :  { %6128 = vmatpush3.msra.mxu1 %v5032_v1 }
 0x80a   :  { %6143 = vmatprep.subr.mxu1 %v6817_v41 }
 0x853   :  { %v4326_v26 = vpop.xlane.xlu1 %4325 }
 0x854   :  { %6220 = vrcp.f32 %v4326_v26 }
 0x855   :  { %v4323_v50 = vpop.xlane.xlu0 %4322 }
 0x856   :  { %6222 = vrcp.f32 %v4323_v50 }
 0x857   :  { %v1164_v30 = vpop.xlane.xlu1 %1163 }
 0x858   :  { %6224 = vrcp.f32 %v1164_v30 }
 0x859   :  { %v1161_v31 = vpop.xlane.xlu0 %1160 }
 0x85a   :  { %6226 = vrcp.f32 %v1161_v31 }
 0x861   :  { %v6221_v23 = vpop.eup %6220 }
 0x863   :  { %v6223_v19 = vpop.eup %6222 }
 0x865   :  { %v6225_v36 = vpop.eup %6224 }
 0x866   :  { %v1682_v39 = vmul.f32 %v6225_v36, %v6599_v9 }
 0x867   :  { %v6227_v37 = vpop.eup %6226 }
 0x868   :  { %v1680_v32 = vmul.f32 %v6227_v37, %v6601_v12 }
 0x86e   :  { %v4850_v34 = vpop.permute.xlu1 %4849 }
 0x86f   :  { %v4870_v40 = vsel %vm635_vm1, %v1682_v39, %v4850_v34 }
 0x870   :  { %v4848_v33 = vpop.permute.xlu0 %4847 }
 0x871   :  { %v4869_v11 = vsel %vm635_vm1, %v1680_v32, %v4848_v33 }
 0x872   :  { %v4856_v35 = vpop.permute.xlu1 %4855 }
 0x873   :  { %v4871_v45 = vsel %vm1146_vm2, %v4869_v11, %v4856_v35 }
 0x874   :  { %v4858_v38 = vpop.permute.xlu0 %4857 }
 0x875   :  { %v4872_v42 = vsel %vm1146_vm2, %v4870_v40, %v4858_v38 }
 0x88f   :  { %v6081_v2 = vpop.f32.mrf.mxu1 }
 0x891   :  { %v4503_v48 = vpop.f32.mrf.mxu1 }
 0x893   :  { %v6095_v52 = vpop.f32.mrf.mxu1 }
 0x895   :  { %v4667_v58 = vpop.f32.mrf.mxu1 }
 0x897   :  { %v6074_v8 = vpop.f32.mrf.mxu0  ;;  %v6109_v15 = vpop.f32.mrf.mxu1 }
 0x898   :  { %v4510_v55 = vadd.f32 %v6081_v2, %v6074_v8 }
 0x899   :  { %v4412_v0 = vpop.f32.mrf.mxu0  ;;  %v4831_v24 = vpop.f32.mrf.mxu1 }
 0x89a   :  { %v4504_v61 = vadd.f32 %v4503_v48, %v4412_v0 }
 0x89b   :  { %v6088_v59 = vpop.f32.mrf.mxu0 }
 0x89c   :  { %v4593_v63 = vadd.f32 %v6088_v59, %v4510_v55 }
 0x89d   :  { %v4585_v5 = vpop.f32.mrf.mxu0 }
 0x89e   :  { %v4586_v10 = vadd.f32 %v4585_v5, %v4504_v61  ;;  %v4676_v13 = vadd.f32 %v6095_v52, %v4593_v63 }
 0x89f   :  { %v6102_v16 = vpop.f32.mrf.mxu0 }
 0x8a0   :  { %v4759_v17 = vadd.f32 %v6102_v16, %v4676_v13  ;;  %v4668_v18 = vadd.f32 %v4667_v58, %v4586_v10 }
 0x8a1   :  { %v4752_v20 = vpop.f32.mrf.mxu0 }
 0x8a2   :  { %v4838_v21 = vadd.f32 %v6109_v15, %v4759_v17  ;;  %v4753_v22 = vadd.f32 %v4752_v20, %v4668_v18 }
 0x8a4   :  { %v4832_v14 = vadd.f32 %v4831_v24, %v4753_v22  ;;  %v4844_v25 = vmul.f32 %v6221_v23, %v4838_v21 }
 0x8a6   :  { %4865 = vrot.lane.b32.xlu0 %v4844_v25, %s6356_s30  ;;  %v4842_v29 = vmul.f32 %v6223_v19, %v4832_v14 }
 0x8a8   :  { %4863 = vrot.lane.b32.xlu1 %v4842_v29, %s6356_s30 }
 0x918   :  { %v4866_v2 = vpop.permute.xlu0 %4865 }
 0x919   :  { %v4875_v43 = vsel %vm4873_vm3, %v4872_v42, %v4866_v2 }
 0x91a   :  { %v4891_v26 = vsel %vm92_vm0, %v4875_v43, 0  ;;  %v4864_v48 = vpop.permute.xlu1 %4863 }
 0x91b   :  { %v4972_v49 = vand.u32 4294901760, %v4891_v26  ;;  %v4874_v50 = vsel %vm4873_vm3, %v4871_v45, %v4864_v48 }
 0x91c   :  { %v4888_v9 = vsel %vm92_vm0, %v4874_v50, 0 }
 0x91d   :  { %v4973_v12 = vsub.f32 %v4891_v26, %v4972_v49  ;;  %v4962_v51 = vand.u32 4294901760, %v4888_v9 }
 0x91f   :  { %v4963_v52 = vsub.f32 %v4888_v9, %v4962_v51  ;;  %6129 = vmatprep.mubr.f32.mxu1 %v4962_v51  ;;  %v4974_v8 = vand.u32 4294901760, %v4973_v12 }
 0x920   :  { %6130 = vmatmul.mubr.f32.vlgmr.msra.gmra.mxu1 %v4972_v49 }
 0x921   :  { %6144 = vmatpush3.msra.mxu1 %v6817_v41  ;;  %v4964_v53 = vand.u32 4294901760, %v4963_v52  ;;  %v4975_v0 = vsub.f32 %v4973_v12, %v4974_v8 }
 0x922   :  { %6145 = vmatprep.subr.mxu1 %v6829_v44 }
 0x923   :  { %6146 = vmatpush3.msra.mxu1 %v6829_v44  ;;  %6151 = vmatprep.mubr.f32.mxu1 %v4964_v53  ;;  %v4965_v6 = vsub.f32 %v4963_v52, %v4964_v53  ;;  %v4976_v56 = vand.u32 4294901760, %v4975_v0 }
 0x924   :  { %6147 = vmatprep.subr.mxu1 %v6834_v47 }
 0x925   :  { %6148 = vmatpush3.msra.mxu1 %v6834_v47  ;;  %v4966_v55 = vand.u32 4294901760, %v4965_v6 }
 0x926   :  { %6149 = vmatprep.subr.mxu1 %v6844_v60 }
 0x927   :  { %6150 = vmatpush3.msra.mxu1 %v6844_v60  ;;  %6118 = vmatprep.mubr.f32.mxu0 %v4966_v55 }
 0x928   :  { %6152 = vmatmul.mubr.f32.vlgmr.msra.gmra.mxu1 %v4974_v8  ;;  %6165 = vmatprep.subr.mxu1 %v6817_v41 }
 0x929   :  { %6119 = vmatmul.mubr.f32.vlgmr.msra.gmra.mxu0 %v4976_v56  ;;  %6166 = vmatpush3.msra.mxu1 %v6817_v41 }
 0x92a   :  { %6133 = vmatpush3.msra.mxu0 %v6820_v3  ;;  %6173 = vmatprep.mubr.f32.mxu1 %v4962_v51  ;;  %v5443_v3 = vld [vmem:[%s6920_s4] ss:$0 sm:$0xff]  ;;  %s6357_s4 = smov [#allocation10]  }
 0x92b   :  { %6134 = vmatprep.subr.mxu0 %v6832_v46  ;;  %6140 = vmatprep.mubr.f32.mxu0 %v4963_v52  ;;  %s5428_s9 = sshll.u32 %s6357_s4, 4  ;;  %s5429_s9 = int_to_ptr.vmem [resolvable:$true] %s5428_s9 }
 0x92c   :  { %6167 = vmatprep.subr.mxu1 %v6829_v44  ;;  %6135 = vmatpush3.msra.mxu0 %v6832_v46  ;;  %s6310_s10 = scalar_lea.vmem %s5429_s9, 256  ;;  %p6315_p7 = scmp.lt.s32.totalorder %s5429_s9, %s5429_s9 }
 0x92d   :  { %6168 = vmatpush3.msra.mxu1 %v6829_v44  ;;  %6136 = vmatprep.subr.mxu0 %v6842_v27  ;;  %p6311_p6 = scmp.ne.s32.totalorder %s5429_s9, %s6310_s10  ;;  %p6316_p8 = scmp.lt.s32.totalorder %s6310_s10, %s6310_s10 }
 0x92e   :  { %6169 = vmatprep.subr.mxu1 %v6834_v47  ;;  %6137 = vmatpush3.msra.mxu0 %v6842_v27 }
 0x92f   :  { %6170 = vmatpush3.msra.mxu1 %v6834_v47  ;;  %6138 = vmatprep.subr.mxu0 %v6854_v28  ;;  %p6317_p9 = por %p6316_p8, %p6315_p7 }
 0x930   :  { %6171 = vmatprep.subr.mxu1 %v6844_v60  ;;  %6139 = vmatpush3.msra.mxu0 %v6854_v28 }
 0x931   :  { %6172 = vmatpush3.msra.mxu1 %v6844_v60  ;;  %6141 = vmatmul.mubr.f32.vlgmr.msra.gmra.mxu0 %v4973_v12  ;;  %p6318_p10 = pnand %p6317_p9, %p6311_p6 }
 0x932   :  { %6154 = vmatprep.subr.mxu0 %v6825_v7  ;;  %6174 = vmatmul.mubr.f32.vlgmr.msra.gmra.mxu1 %v4972_v49 }
 0x933   :  { %6155 = vmatpush3.msra.mxu0 %v6825_v7  ;;  %6162 = vmatprep.mubr.f32.mxu0 %v4962_v51 }
 0x934   :  { %6156 = vmatprep.subr.mxu0 %v6839_v62 }
 0x935   :  { %6157 = vmatpush3.msra.mxu0 %v6839_v62 }
 0x936   :  { %6158 = vmatprep.subr.mxu0 %v6851_v4 }
 0x937   :  { %6159 = vmatpush3.msra.mxu0 %v6851_v4 }
 0x938   :  { %6160 = vmatprep.subr.mxu0 %v6861_v54 }
 0x939   :  { %6161 = vmatpush3.msra.mxu0 %v6861_v54 }
 0x93a   :  { %6163 = vmatmul.mubr.f32.vlgmr.msra.gmra.mxu0 %v4972_v49 }
 0x9e0   :  { %v6131_v7 = vpop.f32.mrf.mxu1 }
 0x9e2   :  { %v5069_v62 = vpop.f32.mrf.mxu1 }
 0x9e8   :  { %v6153_v28 = vpop.f32.mrf.mxu1 }
 0x9e9   :  { %v6120_v41 = vpop.f32.mrf.mxu0 }
 0x9ea   :  { %v4979_v46 = vadd.f32 %v6120_v41, %v5443_v3  ;;  %v5239_v61 = vpop.f32.mrf.mxu1 }
 0x9eb   :  { %v4968_v44 = vpop.f32.mrf.mxu0 }
 0x9ec   :  { %v4969_v47 = vadd.f32 %v5443_v3, %v4968_v44  ;;  %v5076_v60 = vadd.f32 %v6131_v7, %v4979_v46 }
 0x9ee   :  { %v5070_v58 = vadd.f32 %v5069_v62, %v4969_v47 }
 0x9f1   :  { %v6142_v27 = vpop.f32.mrf.mxu0 }
 0x9f2   :  { %v5163_v4 = vadd.f32 %v6142_v27, %v5076_v60  ;;  %v6175_v63 = vpop.f32.mrf.mxu1 }
 0x9f3   :  { %v5155_v57 = vpop.f32.mrf.mxu0 }
 0x9f4   :  { %v5156_v59 = vadd.f32 %v5155_v57, %v5070_v58  ;;  %v5248_v54 = vadd.f32 %v6153_v28, %v5163_v4  ;;  %v5411_v17 = vpop.f32.mrf.mxu1 }
 0x9f6   :  { %v5240_v10 = vadd.f32 %v5239_v61, %v5156_v59 }
 0x9fa   :  { %v6164_v1 = vpop.f32.mrf.mxu0 }
 0x9fb   :  { %v5337_v5 = vadd.f32 %v6164_v1, %v5248_v54 }
 0x9fc   :  { %v5330_v13 = vpop.f32.mrf.mxu0 }
 0x9fd   :  { %v5418_v15 = vadd.f32 %v6175_v63, %v5337_v5  ;;  %v5331_v16 = vadd.f32 %v5330_v13, %v5240_v10 }
 0x9ff   :  { %5422 = vst.msk [vmem:[#allocation10 + $0x8] sm:$0xff] %vm92_vm0, %v5418_v15  ;;  %v5412_v18 = vadd.f32 %v5411_v17, %v5331_v16 }
 0xa01   :  { %5421 = vst.msk [vmem:[#allocation10] sm:$0xff] %vm92_vm0, %v5412_v18 }
 0xa02   :  { %6321 = shalt.err (!%p6318_p10)
}
 0xa03   :  { %5434 = dma.vmem_to_hbm [thread:$0]  %s5429_s9, 256, %s6922_s6, [#allocation4], %s6340_s26, %s6340_s26, %s6341_s27  }
 0xa04   :  { %6336 = dma.done.wait [#allocation4], 256  }
 0xa05   :  { %6337 = vsyncadd [#allocation4], 4294967040 }
 0xa06   :  { %5438 = vsyncpa [#allocation3], 1 }
 0xa07   :  { %5439 = vsyncpa [#allocation6], 1 }
 0xa08   :  { %5440 = vsyncpa [#allocation9], 1 }
 0xa09   :  { %5441 = vsyncpa [#allocation4], 1 }

</bundles_post_ra>
